<compile_context>
chip_gen: v5e
topology: v5e:2x2
jax: 0.10.0
libtpu: 0.0.40
codegen_flags: <defaults>
</compile_context>

<pallas_src>
import jax
import jax.numpy as jnp
import numpy as np
from jax.experimental import pallas as pl
from jax.experimental.pallas import tpu as pltpu


def _round_up(n, m):
    return -(-n // m) * m


def lstm_fc_kernel(x_ref, h0_ref, c0_ref, wih_ref, whh_ref, b_ref,
                   wfc_ref, bfc_ref, out_ref, gx_scr, hs_scr):
    """Single-invocation fused LSTM + Linear (all dims pre-padded in the wrapper).

    x_ref:   (S*Bp, D)      time-major flattened, batch padded to a multiple of 8
    h0/c0:   (Bp, Hp)       initial states, hidden padded to a multiple of 128
    wih_ref: (D, 4*Hp)      W_ih^T, gate blocks at lane-aligned offsets k*Hp
    whh_ref: (Hp, 4*Hp)     W_hh^T, same gate-block layout, zero rows beyond H
    b_ref:   (1, 4*Hp)      b_ih + b_hh, zero in padded lanes
    wfc_ref: (Hp, Op)       W_fc^T, zero rows beyond H / cols beyond O
    bfc_ref: (1, Op)
    out_ref: (S*Bp, Op)
    gx_scr:  VMEM (S*Bp, 4*Hp) f32 ; hs_scr: VMEM (S*Bp, Hp) f32
    """
    Bp, Hp = h0_ref.shape
    SBp = x_ref.shape[0]
    S = SBp // Bp

    # ---- Hoisted input projection: one MXU matmul for all timesteps, bias fused ----
    gx_scr[...] = (jnp.dot(x_ref[...], wih_ref[...],
                           preferred_element_type=jnp.float32)
                   + b_ref[...])                                       # (S*Bp, 4*Hp)

    whh = whh_ref[...]
    h = h0_ref[...].astype(jnp.float32)
    c = c0_ref[...].astype(jnp.float32)

    # ---- Fully-unrolled recurrence: only h @ W_hh^T is on the serial critical path ----
    for t in range(S):
        lo = t * Bp                                                    # multiple of 8 -> aligned view
        g = (gx_scr[lo:lo + Bp, :]
             + jnp.dot(h, whh, preferred_element_type=jnp.float32))   # (Bp, 4*Hp)
        # PyTorch gate order [i | f | g | o]; each block is whole 128-lane vregs, so the
        # slices are layout-free and transcendentals only run on the lanes that are used.
        i_g = jax.nn.sigmoid(g[:, 0 * Hp:1 * Hp])
        f_g = jax.nn.sigmoid(g[:, 1 * Hp:2 * Hp])
        g_g = jnp.tanh(g[:, 2 * Hp:3 * Hp])
        o_g = jax.nn.sigmoid(g[:, 3 * Hp:4 * Hp])
        c = f_g * c + i_g * g_g
        h = o_g * jnp.tanh(c)
        hs_scr[lo:lo + Bp, :] = h                                      # aligned store

    # ---- Hoisted FC: one matmul + one lane-dense store for the whole sequence ----
    out_ref[...] = (jnp.dot(hs_scr[...], wfc_ref[...],
                            preferred_element_type=jnp.float32)
                    + bfc_ref[...]).astype(out_ref.dtype)


def lstm_baseline_forward(x, h0, c0, w_ih, w_hh, b_ih, b_hh, w_fc, b_fc):
    """x: (S, B, D); h0/c0: (1, B, H); PyTorch-layout weights:
       w_ih (4H, D), w_hh (4H, H), b_ih/b_hh (4H,), w_fc (O, H), b_fc (O,)."""
    S, B, D = x.shape
    H = w_hh.shape[1]
    O = w_fc.shape[0]

    # Padded sizes: batch to a sublane tile (8), hidden/output to a lane tile (128).
    Bp = _round_up(B, 8)
    Hp = _round_up(H, 128)
    Op = _round_up(O, 128)

    # ---- Layout plumbing / zero padding in the wrapper (exactness preserved) ----
    x_p = jnp.zeros((S, Bp, D), x.dtype).at[:, :B, :].set(x)
    x2 = x_p.reshape(S * Bp, D)
    h0_p = jnp.zeros((Bp, Hp), jnp.float32).at[:B, :H].set(h0.reshape(B, H).astype(jnp.float32))
    c0_p = jnp.zeros((Bp, Hp), jnp.float32).at[:B, :H].set(c0.reshape(B, H).astype(jnp.float32))

    wih_t = w_ih.T                       # (D, 4H)
    whh_t = w_hh.T                       # (H, 4H)
    bsum = (b_ih + b_hh).reshape(1, 4 * H)

    def pad_gate_cols(a, rows_pad=None):
        """(rows, 4H) -> (rows_pad, 4*Hp), each gate block k placed at columns [k*Hp, k*Hp+H)."""
        rows = a.shape[0]
        rp = rows if rows_pad is None else rows_pad
        out = jnp.zeros((rp, 4 * Hp), a.dtype)
        for k in range(4):
            out = out.at[:rows, k * Hp:k * Hp + H].set(a[:, k * H:(k + 1) * H])
        return out

    wih_p = pad_gate_cols(wih_t)                  # (D, 4*Hp)
    whh_p = pad_gate_cols(whh_t, rows_pad=Hp)     # (Hp, 4*Hp), zero rows beyond H
    b_p = pad_gate_cols(bsum)                     # (1, 4*Hp)

    wfc_p = jnp.zeros((Hp, Op), w_fc.dtype).at[:H, :O].set(w_fc.T)
    bfc_p = jnp.zeros((1, Op), b_fc.dtype).at[0, :O].set(b_fc)

    vmem_spec = pl.BlockSpec(memory_space=pltpu.MemorySpace.VMEM)

    out2 = pl.pallas_call(
        lstm_fc_kernel,
        out_shape=jax.ShapeDtypeStruct((S * Bp, Op), x.dtype),
        in_specs=[vmem_spec] * 8,        # whole (tiny) arrays resident in VMEM, one DMA each
        out_specs=vmem_spec,
        scratch_shapes=[
            pltpu.VMEM((S * Bp, 4 * Hp), jnp.float32),   # hoisted input-projection gates
            pltpu.VMEM((S * Bp, Hp), jnp.float32),       # accumulated hidden states
        ],
    )(x2, h0_p, c0_p, wih_p, whh_p, b_p, wfc_p, bfc_p)

    # Slice away batch / output-lane padding (wrapper-side layout plumbing only).
    return out2.reshape(S, Bp, Op)[:, :B, :O]


def lstm_baseline_reference(x, h0, c0, w_ih, w_hh, b_ih, b_hh, w_fc, b_fc):
    """Pure-JAX reference matching torch.nn.LSTM + nn.Linear semantics."""
    H = w_hh.shape[1]
    h = h0[0].astype(jnp.float32)
    c = c0[0].astype(jnp.float32)

    def step(carry, x_t):
        h, c = carry
        gates = x_t @ w_ih.T + h @ w_hh.T + b_ih + b_hh
        i = jax.nn.sigmoid(gates[:, 0 * H:1 * H])
        f = jax.nn.sigmoid(gates[:, 1 * H:2 * H])
        g = jnp.tanh(gates[:, 2 * H:3 * H])
        o = jax.nn.sigmoid(gates[:, 3 * H:4 * H])
        c_new = f * c + i * g
        h_new = o * jnp.tanh(c_new)
        return (h_new, c_new), h_new

    _, hs = jax.lax.scan(step, (h, c), x.astype(jnp.float32))
    out = hs @ w_fc.T + b_fc
    return out.astype(x.dtype)


if __name__ == "__main__":
    # Module hyperparameters (layers=1, bidirectional=False, layernorm=False)
    input_dim, hidden_dim, output_dim = 16, 32, 8
    seq_len, batch = 8, 2

    key = jax.random.PRNGKey(0)
    keys = jax.random.split(key, 9)
    scale = 1.0 / np.sqrt(hidden_dim)   # PyTorch default uniform(-1/sqrt(H), 1/sqrt(H))

    w_ih = jax.random.uniform(keys[0], (4 * hidden_dim, input_dim), jnp.float32, -scale, scale)
    w_hh = jax.random.uniform(keys[1], (4 * hidden_dim, hidden_dim), jnp.float32, -scale, scale)
    b_ih = jax.random.uniform(keys[2], (4 * hidden_dim,), jnp.float32, -scale, scale)
    b_hh = jax.random.uniform(keys[3], (4 * hidden_dim,), jnp.float32, -scale, scale)
    w_fc = jax.random.uniform(keys[4], (output_dim, hidden_dim), jnp.float32, -scale, scale)
    b_fc = jax.random.uniform(keys[5], (output_dim,), jnp.float32, -scale, scale)

    x = jax.random.normal(keys[6], (seq_len, batch, input_dim), jnp.float32)
    h0 = jax.random.normal(keys[7], (1, batch, hidden_dim), jnp.float32)
    c0 = jax.random.normal(keys[8], (1, batch, hidden_dim), jnp.float32)

    out = lstm_baseline_forward(x, h0, c0, w_ih, w_hh, b_ih, b_hh, w_fc, b_fc)
    out = jax.block_until_ready(out)

    ref = lstm_baseline_reference(x, h0, c0, w_ih, w_hh, b_ih, b_hh, w_fc, b_fc)
    np.testing.assert_allclose(np.asarray(out), np.asarray(ref), rtol=1e-5, atol=1e-5)
    assert out.shape == (seq_len, batch, output_dim)

    print("KERNEL_OK")
</pallas_src>

<mosaic_0001>
module attributes {stable_mosaic.version = 11 : i64} {
  func.func @lstm_fc_kernel(%arg0: memref<64x16xf32, #tpu.memory_space<vmem>>, %arg1: memref<8x128xf32, #tpu.memory_space<vmem>>, %arg2: memref<8x128xf32, #tpu.memory_space<vmem>>, %arg3: memref<16x512xf32, #tpu.memory_space<vmem>>, %arg4: memref<128x512xf32, #tpu.memory_space<vmem>>, %arg5: memref<1x512xf32, #tpu.memory_space<vmem>>, %arg6: memref<128x128xf32, #tpu.memory_space<vmem>>, %arg7: memref<1x128xf32, #tpu.memory_space<vmem>>, %arg8: memref<64x128xf32, #tpu.memory_space<vmem>>, %arg9: memref<64x512xf32, #tpu.memory_space<vmem>>, %arg10: memref<64x128xf32, #tpu.memory_space<vmem>>) attributes {dimension_semantics = [], scalar_prefetch = 0 : i64, scratch_operands = 2 : i64, tpu.core_type = #tpu.core_type<tc>} {
    %c0 = arith.constant 0 : index
    %c0_0 = arith.constant 0 : index
    %0 = vector.load %arg0[%c0, %c0_0] : memref<64x16xf32, #tpu.memory_space<vmem>>, vector<64x16xf32>
    %c0_1 = arith.constant 0 : index
    %c0_2 = arith.constant 0 : index
    %1 = vector.load %arg3[%c0_1, %c0_2] : memref<16x512xf32, #tpu.memory_space<vmem>>, vector<16x512xf32>
    %cst = arith.constant dense<0.000000e+00> : vector<64x512xf32>
    %2 = tpu.matmul %0, %1, %cst {dimension_numbers = #tpu.dot_dimension_numbers<[1], [0], [0], [1], [0, 0, 1, 1], [], []>} : vector<64x16xf32>, vector<16x512xf32>, vector<64x512xf32> -> vector<64x512xf32>
    %c0_3 = arith.constant 0 : index
    %c0_4 = arith.constant 0 : index
    %3 = vector.load %arg5[%c0_3, %c0_4] : memref<1x512xf32, #tpu.memory_space<vmem>>, vector<1x512xf32>
    %4 = vector.broadcast %3 : vector<1x512xf32> to vector<64x512xf32>
    %5 = arith.addf %2, %4 : vector<64x512xf32>
    %c0_5 = arith.constant 0 : index
    %c0_6 = arith.constant 0 : index
    %6 = vector.load %arg9[%c0_5, %c0_6] : memref<64x512xf32, #tpu.memory_space<vmem>>, vector<64x512xf32>
    tpu.vector_store %arg9[%c0_5, %c0_6], %5 {strides = array<i32>} : memref<64x512xf32, #tpu.memory_space<vmem>>, vector<64x512xf32>,
    %c0_7 = arith.constant 0 : index
    %c0_8 = arith.constant 0 : index
    %7 = vector.load %arg4[%c0_7, %c0_8] : memref<128x512xf32, #tpu.memory_space<vmem>>, vector<128x512xf32>
    %c0_9 = arith.constant 0 : index
    %c0_10 = arith.constant 0 : index
    %8 = vector.load %arg1[%c0_9, %c0_10] : memref<8x128xf32, #tpu.memory_space<vmem>>, vector<8x128xf32>
    %c0_11 = arith.constant 0 : index
    %c0_12 = arith.constant 0 : index
    %9 = vector.load %arg2[%c0_11, %c0_12] : memref<8x128xf32, #tpu.memory_space<vmem>>, vector<8x128xf32>
    %c0_13 = arith.constant 0 : index
    %c0_14 = arith.constant 0 : index
    %10 = vector.load %arg9[%c0_13, %c0_14] : memref<64x512xf32, #tpu.memory_space<vmem>>, vector<8x512xf32>
    %cst_15 = arith.constant dense<0.000000e+00> : vector<8x512xf32>
    %11 = tpu.matmul %8, %7, %cst_15 {dimension_numbers = #tpu.dot_dimension_numbers<[1], [0], [0], [1], [0, 0, 1, 1], [], []>} : vector<8x128xf32>, vector<128x512xf32>, vector<8x512xf32> -> vector<8x512xf32>
    %12 = arith.addf %10, %11 : vector<8x512xf32>
    %13 = vector.extract_strided_slice %12 {offsets = [0, 0], sizes = [8, 128], strides = [1, 1]} : vector<8x512xf32> to vector<8x128xf32>
    %14 = arith.negf %13 : vector<8x128xf32>
    %15 = math.exp %14 : vector<8x128xf32>
    %cst_16 = arith.constant 1.000000e+00 : f32
    %16 = vector.broadcast %cst_16 : f32 to vector<8x128xf32>
    %17 = arith.addf %16, %15 : vector<8x128xf32>
    %18 = arith.divf %16, %17 : vector<8x128xf32>
    %19 = vector.extract_strided_slice %12 {offsets = [0, 128], sizes = [8, 128], strides = [1, 1]} : vector<8x512xf32> to vector<8x128xf32>
    %20 = arith.negf %19 : vector<8x128xf32>
    %21 = math.exp %20 : vector<8x128xf32>
    %cst_17 = arith.constant 1.000000e+00 : f32
    %22 = vector.broadcast %cst_17 : f32 to vector<8x128xf32>
    %23 = arith.addf %22, %21 : vector<8x128xf32>
    %24 = arith.divf %22, %23 : vector<8x128xf32>
    %25 = vector.extract_strided_slice %12 {offsets = [0, 256], sizes = [8, 128], strides = [1, 1]} : vector<8x512xf32> to vector<8x128xf32>
    %26 = math.tanh %25 : vector<8x128xf32>
    %27 = vector.extract_strided_slice %12 {offsets = [0, 384], sizes = [8, 128], strides = [1, 1]} : vector<8x512xf32> to vector<8x128xf32>
    %28 = arith.negf %27 : vector<8x128xf32>
    %29 = math.exp %28 : vector<8x128xf32>
    %cst_18 = arith.constant 1.000000e+00 : f32
    %30 = vector.broadcast %cst_18 : f32 to vector<8x128xf32>
    %31 = arith.addf %30, %29 : vector<8x128xf32>
    %32 = arith.divf %30, %31 : vector<8x128xf32>
    %33 = arith.mulf %24, %9 : vector<8x128xf32>
    %34 = arith.mulf %18, %26 : vector<8x128xf32>
    %35 = arith.addf %33, %34 : vector<8x128xf32>
    %36 = math.tanh %35 : vector<8x128xf32>
    %37 = arith.mulf %32, %36 : vector<8x128xf32>
    %c0_19 = arith.constant 0 : index
    %c0_20 = arith.constant 0 : index
    %38 = vector.load %arg10[%c0_19, %c0_20] : memref<64x128xf32, #tpu.memory_space<vmem>>, vector<8x128xf32>
    tpu.vector_store %arg10[%c0_19, %c0_20], %37 {strides = array<i32>} : memref<64x128xf32, #tpu.memory_space<vmem>>, vector<8x128xf32>,
    %c8 = arith.constant 8 : index
    %c0_21 = arith.constant 0 : index
    %39 = vector.load %arg9[%c8, %c0_21] : memref<64x512xf32, #tpu.memory_space<vmem>>, vector<8x512xf32>
    %cst_22 = arith.constant dense<0.000000e+00> : vector<8x512xf32>
    %40 = tpu.matmul %37, %7, %cst_22 {dimension_numbers = #tpu.dot_dimension_numbers<[1], [0], [0], [1], [0, 0, 1, 1], [], []>} : vector<8x128xf32>, vector<128x512xf32>, vector<8x512xf32> -> vector<8x512xf32>
    %41 = arith.addf %39, %40 : vector<8x512xf32>
    %42 = vector.extract_strided_slice %41 {offsets = [0, 0], sizes = [8, 128], strides = [1, 1]} : vector<8x512xf32> to vector<8x128xf32>
    %43 = arith.negf %42 : vector<8x128xf32>
    %44 = math.exp %43 : vector<8x128xf32>
    %cst_23 = arith.constant 1.000000e+00 : f32
    %45 = vector.broadcast %cst_23 : f32 to vector<8x128xf32>
    %46 = arith.addf %45, %44 : vector<8x128xf32>
    %47 = arith.divf %45, %46 : vector<8x128xf32>
    %48 = vector.extract_strided_slice %41 {offsets = [0, 128], sizes = [8, 128], strides = [1, 1]} : vector<8x512xf32> to vector<8x128xf32>
    %49 = arith.negf %48 : vector<8x128xf32>
    %50 = math.exp %49 : vector<8x128xf32>
    %cst_24 = arith.constant 1.000000e+00 : f32
    %51 = vector.broadcast %cst_24 : f32 to vector<8x128xf32>
    %52 = arith.addf %51, %50 : vector<8x128xf32>
    %53 = arith.divf %51, %52 : vector<8x128xf32>
    %54 = vector.extract_strided_slice %41 {offsets = [0, 256], sizes = [8, 128], strides = [1, 1]} : vector<8x512xf32> to vector<8x128xf32>
    %55 = math.tanh %54 : vector<8x128xf32>
    %56 = vector.extract_strided_slice %41 {offsets = [0, 384], sizes = [8, 128], strides = [1, 1]} : vector<8x512xf32> to vector<8x128xf32>
    %57 = arith.negf %56 : vector<8x128xf32>
    %58 = math.exp %57 : vector<8x128xf32>
    %cst_25 = arith.constant 1.000000e+00 : f32
    %59 = vector.broadcast %cst_25 : f32 to vector<8x128xf32>
    %60 = arith.addf %59, %58 : vector<8x128xf32>
    %61 = arith.divf %59, %60 : vector<8x128xf32>
    %62 = arith.mulf %53, %35 : vector<8x128xf32>
    %63 = arith.mulf %47, %55 : vector<8x128xf32>
    %64 = arith.addf %62, %63 : vector<8x128xf32>
    %65 = math.tanh %64 : vector<8x128xf32>
    %66 = arith.mulf %61, %65 : vector<8x128xf32>
    %c8_26 = arith.constant 8 : index
    %c0_27 = arith.constant 0 : index
    %67 = vector.load %arg10[%c8_26, %c0_27] : memref<64x128xf32, #tpu.memory_space<vmem>>, vector<8x128xf32>
    tpu.vector_store %arg10[%c8_26, %c0_27], %66 {strides = array<i32>} : memref<64x128xf32, #tpu.memory_space<vmem>>, vector<8x128xf32>,
    %c16 = arith.constant 16 : index
    %c0_28 = arith.constant 0 : index
    %68 = vector.load %arg9[%c16, %c0_28] : memref<64x512xf32, #tpu.memory_space<vmem>>, vector<8x512xf32>
    %cst_29 = arith.constant dense<0.000000e+00> : vector<8x512xf32>
    %69 = tpu.matmul %66, %7, %cst_29 {dimension_numbers = #tpu.dot_dimension_numbers<[1], [0], [0], [1], [0, 0, 1, 1], [], []>} : vector<8x128xf32>, vector<128x512xf32>, vector<8x512xf32> -> vector<8x512xf32>
    %70 = arith.addf %68, %69 : vector<8x512xf32>
    %71 = vector.extract_strided_slice %70 {offsets = [0, 0], sizes = [8, 128], strides = [1, 1]} : vector<8x512xf32> to vector<8x128xf32>
    %72 = arith.negf %71 : vector<8x128xf32>
    %73 = math.exp %72 : vector<8x128xf32>
    %cst_30 = arith.constant 1.000000e+00 : f32
    %74 = vector.broadcast %cst_30 : f32 to vector<8x128xf32>
    %75 = arith.addf %74, %73 : vector<8x128xf32>
    %76 = arith.divf %74, %75 : vector<8x128xf32>
    %77 = vector.extract_strided_slice %70 {offsets = [0, 128], sizes = [8, 128], strides = [1, 1]} : vector<8x512xf32> to vector<8x128xf32>
    %78 = arith.negf %77 : vector<8x128xf32>
    %79 = math.exp %78 : vector<8x128xf32>
    %cst_31 = arith.constant 1.000000e+00 : f32
    %80 = vector.broadcast %cst_31 : f32 to vector<8x128xf32>
    %81 = arith.addf %80, %79 : vector<8x128xf32>
    %82 = arith.divf %80, %81 : vector<8x128xf32>
    %83 = vector.extract_strided_slice %70 {offsets = [0, 256], sizes = [8, 128], strides = [1, 1]} : vector<8x512xf32> to vector<8x128xf32>
    %84 = math.tanh %83 : vector<8x128xf32>
    %85 = vector.extract_strided_slice %70 {offsets = [0, 384], sizes = [8, 128], strides = [1, 1]} : vector<8x512xf32> to vector<8x128xf32>
    %86 = arith.negf %85 : vector<8x128xf32>
    %87 = math.exp %86 : vector<8x128xf32>
    %cst_32 = arith.constant 1.000000e+00 : f32
    %88 = vector.broadcast %cst_32 : f32 to vector<8x128xf32>
    %89 = arith.addf %88, %87 : vector<8x128xf32>
    %90 = arith.divf %88, %89 : vector<8x128xf32>
    %91 = arith.mulf %82, %64 : vector<8x128xf32>
    %92 = arith.mulf %76, %84 : vector<8x128xf32>
    %93 = arith.addf %91, %92 : vector<8x128xf32>
    %94 = math.tanh %93 : vector<8x128xf32>
    %95 = arith.mulf %90, %94 : vector<8x128xf32>
    %c16_33 = arith.constant 16 : index
    %c0_34 = arith.constant 0 : index
    %96 = vector.load %arg10[%c16_33, %c0_34] : memref<64x128xf32, #tpu.memory_space<vmem>>, vector<8x128xf32>
    tpu.vector_store %arg10[%c16_33, %c0_34], %95 {strides = array<i32>} : memref<64x128xf32, #tpu.memory_space<vmem>>, vector<8x128xf32>,
    %c24 = arith.constant 24 : index
    %c0_35 = arith.constant 0 : index
    %97 = vector.load %arg9[%c24, %c0_35] : memref<64x512xf32, #tpu.memory_space<vmem>>, vector<8x512xf32>
    %cst_36 = arith.constant dense<0.000000e+00> : vector<8x512xf32>
    %98 = tpu.matmul %95, %7, %cst_36 {dimension_numbers = #tpu.dot_dimension_numbers<[1], [0], [0], [1], [0, 0, 1, 1], [], []>} : vector<8x128xf32>, vector<128x512xf32>, vector<8x512xf32> -> vector<8x512xf32>
    %99 = arith.addf %97, %98 : vector<8x512xf32>
    %100 = vector.extract_strided_slice %99 {offsets = [0, 0], sizes = [8, 128], strides = [1, 1]} : vector<8x512xf32> to vector<8x128xf32>
    %101 = arith.negf %100 : vector<8x128xf32>
    %102 = math.exp %101 : vector<8x128xf32>
    %cst_37 = arith.constant 1.000000e+00 : f32
    %103 = vector.broadcast %cst_37 : f32 to vector<8x128xf32>
    %104 = arith.addf %103, %102 : vector<8x128xf32>
    %105 = arith.divf %103, %104 : vector<8x128xf32>
    %106 = vector.extract_strided_slice %99 {offsets = [0, 128], sizes = [8, 128], strides = [1, 1]} : vector<8x512xf32> to vector<8x128xf32>
    %107 = arith.negf %106 : vector<8x128xf32>
    %108 = math.exp %107 : vector<8x128xf32>
    %cst_38 = arith.constant 1.000000e+00 : f32
    %109 = vector.broadcast %cst_38 : f32 to vector<8x128xf32>
    %110 = arith.addf %109, %108 : vector<8x128xf32>
    %111 = arith.divf %109, %110 : vector<8x128xf32>
    %112 = vector.extract_strided_slice %99 {offsets = [0, 256], sizes = [8, 128], strides = [1, 1]} : vector<8x512xf32> to vector<8x128xf32>
    %113 = math.tanh %112 : vector<8x128xf32>
    %114 = vector.extract_strided_slice %99 {offsets = [0, 384], sizes = [8, 128], strides = [1, 1]} : vector<8x512xf32> to vector<8x128xf32>
    %115 = arith.negf %114 : vector<8x128xf32>
    %116 = math.exp %115 : vector<8x128xf32>
    %cst_39 = arith.constant 1.000000e+00 : f32
    %117 = vector.broadcast %cst_39 : f32 to vector<8x128xf32>
    %118 = arith.addf %117, %116 : vector<8x128xf32>
    %119 = arith.divf %117, %118 : vector<8x128xf32>
    %120 = arith.mulf %111, %93 : vector<8x128xf32>
    %121 = arith.mulf %105, %113 : vector<8x128xf32>
    %122 = arith.addf %120, %121 : vector<8x128xf32>
    %123 = math.tanh %122 : vector<8x128xf32>
    %124 = arith.mulf %119, %123 : vector<8x128xf32>
    %c24_40 = arith.constant 24 : index
    %c0_41 = arith.constant 0 : index
    %125 = vector.load %arg10[%c24_40, %c0_41] : memref<64x128xf32, #tpu.memory_space<vmem>>, vector<8x128xf32>
    tpu.vector_store %arg10[%c24_40, %c0_41], %124 {strides = array<i32>} : memref<64x128xf32, #tpu.memory_space<vmem>>, vector<8x128xf32>,
    %c32 = arith.constant 32 : index
    %c0_42 = arith.constant 0 : index
    %126 = vector.load %arg9[%c32, %c0_42] : memref<64x512xf32, #tpu.memory_space<vmem>>, vector<8x512xf32>
    %cst_43 = arith.constant dense<0.000000e+00> : vector<8x512xf32>
    %127 = tpu.matmul %124, %7, %cst_43 {dimension_numbers = #tpu.dot_dimension_numbers<[1], [0], [0], [1], [0, 0, 1, 1], [], []>} : vector<8x128xf32>, vector<128x512xf32>, vector<8x512xf32> -> vector<8x512xf32>
    %128 = arith.addf %126, %127 : vector<8x512xf32>
    %129 = vector.extract_strided_slice %128 {offsets = [0, 0], sizes = [8, 128], strides = [1, 1]} : vector<8x512xf32> to vector<8x128xf32>
    %130 = arith.negf %129 : vector<8x128xf32>
    %131 = math.exp %130 : vector<8x128xf32>
    %cst_44 = arith.constant 1.000000e+00 : f32
    %132 = vector.broadcast %cst_44 : f32 to vector<8x128xf32>
    %133 = arith.addf %132, %131 : vector<8x128xf32>
    %134 = arith.divf %132, %133 : vector<8x128xf32>
    %135 = vector.extract_strided_slice %128 {offsets = [0, 128], sizes = [8, 128], strides = [1, 1]} : vector<8x512xf32> to vector<8x128xf32>
    %136 = arith.negf %135 : vector<8x128xf32>
    %137 = math.exp %136 : vector<8x128xf32>
    %cst_45 = arith.constant 1.000000e+00 : f32
    %138 = vector.broadcast %cst_45 : f32 to vector<8x128xf32>
    %139 = arith.addf %138, %137 : vector<8x128xf32>
    %140 = arith.divf %138, %139 : vector<8x128xf32>
    %141 = vector.extract_strided_slice %128 {offsets = [0, 256], sizes = [8, 128], strides = [1, 1]} : vector<8x512xf32> to vector<8x128xf32>
    %142 = math.tanh %141 : vector<8x128xf32>
    %143 = vector.extract_strided_slice %128 {offsets = [0, 384], sizes = [8, 128], strides = [1, 1]} : vector<8x512xf32> to vector<8x128xf32>
    %144 = arith.negf %143 : vector<8x128xf32>
    %145 = math.exp %144 : vector<8x128xf32>
    %cst_46 = arith.constant 1.000000e+00 : f32
    %146 = vector.broadcast %cst_46 : f32 to vector<8x128xf32>
    %147 = arith.addf %146, %145 : vector<8x128xf32>
    %148 = arith.divf %146, %147 : vector<8x128xf32>
    %149 = arith.mulf %140, %122 : vector<8x128xf32>
    %150 = arith.mulf %134, %142 : vector<8x128xf32>
    %151 = arith.addf %149, %150 : vector<8x128xf32>
    %152 = math.tanh %151 : vector<8x128xf32>
    %153 = arith.mulf %148, %152 : vector<8x128xf32>
    %c32_47 = arith.constant 32 : index
    %c0_48 = arith.constant 0 : index
    %154 = vector.load %arg10[%c32_47, %c0_48] : memref<64x128xf32, #tpu.memory_space<vmem>>, vector<8x128xf32>
    tpu.vector_store %arg10[%c32_47, %c0_48], %153 {strides = array<i32>} : memref<64x128xf32, #tpu.memory_space<vmem>>, vector<8x128xf32>,
    %c40 = arith.constant 40 : index
    %c0_49 = arith.constant 0 : index
    %155 = vector.load %arg9[%c40, %c0_49] : memref<64x512xf32, #tpu.memory_space<vmem>>, vector<8x512xf32>
    %cst_50 = arith.constant dense<0.000000e+00> : vector<8x512xf32>
    %156 = tpu.matmul %153, %7, %cst_50 {dimension_numbers = #tpu.dot_dimension_numbers<[1], [0], [0], [1], [0, 0, 1, 1], [], []>} : vector<8x128xf32>, vector<128x512xf32>, vector<8x512xf32> -> vector<8x512xf32>
    %157 = arith.addf %155, %156 : vector<8x512xf32>
    %158 = vector.extract_strided_slice %157 {offsets = [0, 0], sizes = [8, 128], strides = [1, 1]} : vector<8x512xf32> to vector<8x128xf32>
    %159 = arith.negf %158 : vector<8x128xf32>
    %160 = math.exp %159 : vector<8x128xf32>
    %cst_51 = arith.constant 1.000000e+00 : f32
    %161 = vector.broadcast %cst_51 : f32 to vector<8x128xf32>
    %162 = arith.addf %161, %160 : vector<8x128xf32>
    %163 = arith.divf %161, %162 : vector<8x128xf32>
    %164 = vector.extract_strided_slice %157 {offsets = [0, 128], sizes = [8, 128], strides = [1, 1]} : vector<8x512xf32> to vector<8x128xf32>
    %165 = arith.negf %164 : vector<8x128xf32>
    %166 = math.exp %165 : vector<8x128xf32>
    %cst_52 = arith.constant 1.000000e+00 : f32
    %167 = vector.broadcast %cst_52 : f32 to vector<8x128xf32>
    %168 = arith.addf %167, %166 : vector<8x128xf32>
    %169 = arith.divf %167, %168 : vector<8x128xf32>
    %170 = vector.extract_strided_slice %157 {offsets = [0, 256], sizes = [8, 128], strides = [1, 1]} : vector<8x512xf32> to vector<8x128xf32>
    %171 = math.tanh %170 : vector<8x128xf32>
    %172 = vector.extract_strided_slice %157 {offsets = [0, 384], sizes = [8, 128], strides = [1, 1]} : vector<8x512xf32> to vector<8x128xf32>
    %173 = arith.negf %172 : vector<8x128xf32>
    %174 = math.exp %173 : vector<8x128xf32>
    %cst_53 = arith.constant 1.000000e+00 : f32
    %175 = vector.broadcast %cst_53 : f32 to vector<8x128xf32>
    %176 = arith.addf %175, %174 : vector<8x128xf32>
    %177 = arith.divf %175, %176 : vector<8x128xf32>
    %178 = arith.mulf %169, %151 : vector<8x128xf32>
    %179 = arith.mulf %163, %171 : vector<8x128xf32>
    %180 = arith.addf %178, %179 : vector<8x128xf32>
    %181 = math.tanh %180 : vector<8x128xf32>
    %182 = arith.mulf %177, %181 : vector<8x128xf32>
    %c40_54 = arith.constant 40 : index
    %c0_55 = arith.constant 0 : index
    %183 = vector.load %arg10[%c40_54, %c0_55] : memref<64x128xf32, #tpu.memory_space<vmem>>, vector<8x128xf32>
    tpu.vector_store %arg10[%c40_54, %c0_55], %182 {strides = array<i32>} : memref<64x128xf32, #tpu.memory_space<vmem>>, vector<8x128xf32>,
    %c48 = arith.constant 48 : index
    %c0_56 = arith.constant 0 : index
    %184 = vector.load %arg9[%c48, %c0_56] : memref<64x512xf32, #tpu.memory_space<vmem>>, vector<8x512xf32>
    %cst_57 = arith.constant dense<0.000000e+00> : vector<8x512xf32>
    %185 = tpu.matmul %182, %7, %cst_57 {dimension_numbers = #tpu.dot_dimension_numbers<[1], [0], [0], [1], [0, 0, 1, 1], [], []>} : vector<8x128xf32>, vector<128x512xf32>, vector<8x512xf32> -> vector<8x512xf32>
    %186 = arith.addf %184, %185 : vector<8x512xf32>
    %187 = vector.extract_strided_slice %186 {offsets = [0, 0], sizes = [8, 128], strides = [1, 1]} : vector<8x512xf32> to vector<8x128xf32>
    %188 = arith.negf %187 : vector<8x128xf32>
    %189 = math.exp %188 : vector<8x128xf32>
    %cst_58 = arith.constant 1.000000e+00 : f32
    %190 = vector.broadcast %cst_58 : f32 to vector<8x128xf32>
    %191 = arith.addf %190, %189 : vector<8x128xf32>
    %192 = arith.divf %190, %191 : vector<8x128xf32>
    %193 = vector.extract_strided_slice %186 {offsets = [0, 128], sizes = [8, 128], strides = [1, 1]} : vector<8x512xf32> to vector<8x128xf32>
    %194 = arith.negf %193 : vector<8x128xf32>
    %195 = math.exp %194 : vector<8x128xf32>
    %cst_59 = arith.constant 1.000000e+00 : f32
    %196 = vector.broadcast %cst_59 : f32 to vector<8x128xf32>
    %197 = arith.addf %196, %195 : vector<8x128xf32>
    %198 = arith.divf %196, %197 : vector<8x128xf32>
    %199 = vector.extract_strided_slice %186 {offsets = [0, 256], sizes = [8, 128], strides = [1, 1]} : vector<8x512xf32> to vector<8x128xf32>
    %200 = math.tanh %199 : vector<8x128xf32>
    %201 = vector.extract_strided_slice %186 {offsets = [0, 384], sizes = [8, 128], strides = [1, 1]} : vector<8x512xf32> to vector<8x128xf32>
    %202 = arith.negf %201 : vector<8x128xf32>
    %203 = math.exp %202 : vector<8x128xf32>
    %cst_60 = arith.constant 1.000000e+00 : f32
    %204 = vector.broadcast %cst_60 : f32 to vector<8x128xf32>
    %205 = arith.addf %204, %203 : vector<8x128xf32>
    %206 = arith.divf %204, %205 : vector<8x128xf32>
    %207 = arith.mulf %198, %180 : vector<8x128xf32>
    %208 = arith.mulf %192, %200 : vector<8x128xf32>
    %209 = arith.addf %207, %208 : vector<8x128xf32>
    %210 = math.tanh %209 : vector<8x128xf32>
    %211 = arith.mulf %206, %210 : vector<8x128xf32>
    %c48_61 = arith.constant 48 : index
    %c0_62 = arith.constant 0 : index
    %212 = vector.load %arg10[%c48_61, %c0_62] : memref<64x128xf32, #tpu.memory_space<vmem>>, vector<8x128xf32>
    tpu.vector_store %arg10[%c48_61, %c0_62], %211 {strides = array<i32>} : memref<64x128xf32, #tpu.memory_space<vmem>>, vector<8x128xf32>,
    %c56 = arith.constant 56 : index
    %c0_63 = arith.constant 0 : index
    %213 = vector.load %arg9[%c56, %c0_63] : memref<64x512xf32, #tpu.memory_space<vmem>>, vector<8x512xf32>
    %cst_64 = arith.constant dense<0.000000e+00> : vector<8x512xf32>
    %214 = tpu.matmul %211, %7, %cst_64 {dimension_numbers = #tpu.dot_dimension_numbers<[1], [0], [0], [1], [0, 0, 1, 1], [], []>} : vector<8x128xf32>, vector<128x512xf32>, vector<8x512xf32> -> vector<8x512xf32>
    %215 = arith.addf %213, %214 : vector<8x512xf32>
    %216 = vector.extract_strided_slice %215 {offsets = [0, 0], sizes = [8, 128], strides = [1, 1]} : vector<8x512xf32> to vector<8x128xf32>
    %217 = arith.negf %216 : vector<8x128xf32>
    %218 = math.exp %217 : vector<8x128xf32>
    %cst_65 = arith.constant 1.000000e+00 : f32
    %219 = vector.broadcast %cst_65 : f32 to vector<8x128xf32>
    %220 = arith.addf %219, %218 : vector<8x128xf32>
    %221 = arith.divf %219, %220 : vector<8x128xf32>
    %222 = vector.extract_strided_slice %215 {offsets = [0, 128], sizes = [8, 128], strides = [1, 1]} : vector<8x512xf32> to vector<8x128xf32>
    %223 = arith.negf %222 : vector<8x128xf32>
    %224 = math.exp %223 : vector<8x128xf32>
    %cst_66 = arith.constant 1.000000e+00 : f32
    %225 = vector.broadcast %cst_66 : f32 to vector<8x128xf32>
    %226 = arith.addf %225, %224 : vector<8x128xf32>
    %227 = arith.divf %225, %226 : vector<8x128xf32>
    %228 = vector.extract_strided_slice %215 {offsets = [0, 256], sizes = [8, 128], strides = [1, 1]} : vector<8x512xf32> to vector<8x128xf32>
    %229 = math.tanh %228 : vector<8x128xf32>
    %230 = vector.extract_strided_slice %215 {offsets = [0, 384], sizes = [8, 128], strides = [1, 1]} : vector<8x512xf32> to vector<8x128xf32>
    %231 = arith.negf %230 : vector<8x128xf32>
    %232 = math.exp %231 : vector<8x128xf32>
    %cst_67 = arith.constant 1.000000e+00 : f32
    %233 = vector.broadcast %cst_67 : f32 to vector<8x128xf32>
    %234 = arith.addf %233, %232 : vector<8x128xf32>
    %235 = arith.divf %233, %234 : vector<8x128xf32>
    %236 = arith.mulf %227, %209 : vector<8x128xf32>
    %237 = arith.mulf %221, %229 : vector<8x128xf32>
    %238 = arith.addf %236, %237 : vector<8x128xf32>
    %239 = math.tanh %238 : vector<8x128xf32>
    %240 = arith.mulf %235, %239 : vector<8x128xf32>
    %c56_68 = arith.constant 56 : index
    %c0_69 = arith.constant 0 : index
    %241 = vector.load %arg10[%c56_68, %c0_69] : memref<64x128xf32, #tpu.memory_space<vmem>>, vector<8x128xf32>
    tpu.vector_store %arg10[%c56_68, %c0_69], %240 {strides = array<i32>} : memref<64x128xf32, #tpu.memory_space<vmem>>, vector<8x128xf32>,
    %c0_70 = arith.constant 0 : index
    %c0_71 = arith.constant 0 : index
    %242 = vector.load %arg10[%c0_70, %c0_71] : memref<64x128xf32, #tpu.memory_space<vmem>>, vector<64x128xf32>
    %c0_72 = arith.constant 0 : index
    %c0_73 = arith.constant 0 : index
    %243 = vector.load %arg6[%c0_72, %c0_73] : memref<128x128xf32, #tpu.memory_space<vmem>>, vector<128x128xf32>
    %cst_74 = arith.constant dense<0.000000e+00> : vector<64x128xf32>
    %244 = tpu.matmul %242, %243, %cst_74 {dimension_numbers = #tpu.dot_dimension_numbers<[1], [0], [0], [1], [0, 0, 1, 1], [], []>} : vector<64x128xf32>, vector<128x128xf32>, vector<64x128xf32> -> vector<64x128xf32>
    %c0_75 = arith.constant 0 : index
    %c0_76 = arith.constant 0 : index
    %245 = vector.load %arg7[%c0_75, %c0_76] : memref<1x128xf32, #tpu.memory_space<vmem>>, vector<1x128xf32>
    %246 = vector.broadcast %245 : vector<1x128xf32> to vector<64x128xf32>
    %247 = arith.addf %244, %246 : vector<64x128xf32>
    %c0_77 = arith.constant 0 : index
    %c0_78 = arith.constant 0 : index
    %248 = vector.load %arg8[%c0_77, %c0_78] : memref<64x128xf32, #tpu.memory_space<vmem>>, vector<64x128xf32>
    tpu.vector_store %arg8[%c0_77, %c0_78], %247 {strides = array<i32>} : memref<64x128xf32, #tpu.memory_space<vmem>>, vector<64x128xf32>,
    return
  }
}

</mosaic_0001>

<bundles_post_ra>
// kernel: tpu_custom_call.1
= control target key start
LH: loop header
LB: loop body
LE: loop exit
PB: predicated region body
PF: predicated region fallthrough
CT: control target
= control target key end

     0   :  { %13 = vsyncpa [#allocation5], 0  ;;  %s3191_s0 = inlined_call_operand.vmem [shape: f32[64,16], index: 0, kind: input, shape index: {}]   ;;  %s3192_s1 = inlined_call_operand.vmem [shape: f32[8,128], index: 1, kind: input, shape index: {}]   ;;  %s3193_s2 = inlined_call_operand.vmem [shape: f32[8,128], index: 2, kind: input, shape index: {}]   ;;  %s3194_s3 = inlined_call_operand.vmem [shape: f32[16,512], index: 3, kind: input, shape index: {}]   ;;  %s3195_s4 = inlined_call_operand.hbm [shape: f32[128,512], index: 4, kind: input, shape index: {}]   ;;  %s3196_s5 = inlined_call_operand.vmem [shape: f32[1,512], index: 5, kind: input, shape index: {}]   ;;  %s3197_s6 = inlined_call_operand.hbm [shape: f32[128,128], index: 6, kind: input, shape index: {}]   ;;  %s3198_s7 = inlined_call_operand.vmem [shape: f32[1,128], index: 7, kind: input, shape index: {}]   ;;  %s3199_s8 = inlined_call_operand.hbm [shape: f32[64,128], index: 8, kind: output, shape index: {}]  }
   0x1   :  { %14 = vsyncpa [#allocation8], 0 }
   0x2   :  { %15 = vsyncpa [#allocation6], 0  ;;  %s28_s29 = sshll.u32 %s3195_s4, 4  ;;  %s2026_s30 = smov [#allocation4]   ;;  %s29_s29 = int_to_ptr.hbm [resolvable:$true] %s28_s29 }
   0x3   :  { %s30_s9 = sshll.u32 %s2026_s30, 4  ;;  %s43_s12 = sshll.u32 %s3197_s6, 4  ;;  %s31_s9 = int_to_ptr.vmem [resolvable:$true] %s30_s9  ;;  %s44_s12 = int_to_ptr.hbm [resolvable:$true] %s43_s12 }
   0x4   :  { %s2027_s13 = smov 512   ;;  %s2028_s14 = smov 32  }
   0x5   :  { %36 = dma.hbm_to_vmem [thread:$0]  %s29_s29, 8192, %s31_s9, [#allocation5], %s2027_s13, %s2027_s13, %s2028_s14  }
   0x6   :  { %s2029_s15 = smov [#allocation7]   ;;  %s2030_s17 = smov 128  }
   0x7   :  { %s45_s16 = sshll.u32 %s2029_s15, 4  ;;  %s2031_s18 = smov 8   ;;  %s46_s16 = int_to_ptr.vmem [resolvable:$true] %s45_s16 }
   0x8   :  { %51 = dma.hbm_to_vmem [thread:$0]  %s44_s12, 2048, %s46_s16, [#allocation8], %s2030_s17, %s2030_s17, %s2031_s18  }
   0x9   :  { %2020 = dma.done.wait [#allocation5], 8192  }
   0xa   :  { %2021 = vsyncadd [#allocation5], 4294959104 }
   0xb   :  { %2022 = dma.done.wait [#allocation8], 2048  }
   0xc   :  { %2023 = vsyncadd [#allocation8], 4294965248  ;;  %v74_v0 = vld [vmem:[%s3194_s3 + $0x20] sm:$0xff]  ;;  %v76_v1 = vld [vmem:[%s3194_s3 + $0x30] sm:$0xff]  ;;  %vm88_vm0 = vcmask 130048   ;;  %s1674_s11 = sshll.u32 %s3199_s8, 4  ;;  %s1675_s11 = int_to_ptr.hbm [resolvable:$true] %s1674_s11 }
   0xd   :  { %v70_v2 = vld [vmem:[%s3194_s3] sm:$0xff]  ;;  %1744 = vmatpush.msra.mxu1 %v74_v0  ;;  %1745 = vmatpush.msra.mxu3 %v74_v0  ;;  %v72_v3 = vld [vmem:[%s3194_s3 + $0x10] sm:$0xff]  ;;  %v2107_v5 = vld [vmem:[%s3191_s0 + $0x28] sm:$0xff] }
   0xe   :  { %v2102_v4 = vld [vmem:[%s3191_s0 + $0x20] sm:$0xff]  ;;  %209 = vmatpush.msra.mxu2 %v76_v1  ;;  %127 = vmatpush.msra.mxu0 %v74_v0  ;;  %v77_v7 = vld [vmem:[%s3194_s3 + $0x38] sm:$0xff]  ;;  %v75_v8 = vld [vmem:[%s3194_s3 + $0x28] sm:$0xff] }
   0xf   :  { %v2112_v6 = vld [vmem:[%s3191_s0] sm:$0xff]  ;;  %1746 = vmatpush.msra.mxu1 %v70_v2  ;;  %1747 = vmatpush.msra.mxu3 %v70_v2  ;;  %v71_v10 = vld [vmem:[%s3194_s3 + $0x8] sm:$0xff]  ;;  %v73_v11 = vld [vmem:[%s3194_s3 + $0x18] sm:$0xff] }
  0x10   :  { %210 = vmatpush.msra.mxu2 %v72_v3  ;;  %1692 = vmatmul.msk.f32.vlgmr.msra.gmra.mxu1 %vm88_vm0, %v2102_v4  ;;  %v2122_v9 = vld [vmem:[#allocation4 + $0x1e0] sm:$0xff]  ;;  %v2136_v13 = vld [vmem:[#allocation4 + $0x1e8] sm:$0xff]  ;;  %v2143_v16 = vld [vmem:[#allocation4 + $0x1f8] sm:$0xff] }
  0x11   :  { %1693 = vmatmul.msk.f32.vlgmr.msra.gmra.mxu3 %vm88_vm0, %v2107_v5  ;;  %1704 = vmatmul.msk.f32.vlgmr.msra.gmra.mxu2 %vm88_vm0, %v2112_v6  ;;  %v2134_v12 = vld [vmem:[#allocation4 + $0x1c0] sm:$0xff]  ;;  %v2141_v15 = vld [vmem:[#allocation4 + $0x1c8] sm:$0xff]  ;;  %v2150_v17 = vld [vmem:[%s3191_s0 + $0x30] sm:$0xff] }
  0x12   :  { %250 = vmatpush.msrb.mxu3 %v77_v7  ;;  %168 = vmatpush.msrb.mxu1 %v75_v8  ;;  %v2139_v14 = vld [vmem:[#allocation4 + $0x1a0] sm:$0xff]  ;;  %v2155_v18 = vld [vmem:[%s3191_s0 + $0x8] sm:$0xff]  ;;  %v2158_v19 = vld [vmem:[#allocation4 + $0x1d8] sm:$0xff] }
  0x13   :  { %379 = vmatpush.msrb.mxu2 %v2122_v9  ;;  %128 = vmatpush.msra.mxu0 %v70_v2  ;;  %v2163_v20 = vld [vmem:[#allocation4 + $0x180] sm:$0xff]  ;;  %v2166_v21 = vld [vmem:[#allocation4 + $0x1a8] sm:$0xff]  ;;  %v2171_v22 = vld [vmem:[#allocation4 + $0x1b8] sm:$0xff] }
  0x14   :  { %169 = vmatpush.msrb.mxu1 %v71_v10  ;;  %251 = vmatpush.msrb.mxu3 %v73_v11  ;;  %v2177_v23 = vld [vmem:[#allocation4 + $0x160] sm:$0xff]  ;;  %v2179_v24 = vld [vmem:[#allocation4 + $0x188] sm:$0xff]  ;;  %v2183_v25 = vld [vmem:[#allocation4 + $0x198] sm:$0xff] }
  0x15   :  { %380 = vmatpush.msrb.mxu2 %v2134_v12  ;;  %1688 = vmatmul.msk.f32.vlgmr.msra.gmra.mxu0 %vm88_vm0, %v2112_v6  ;;  %v2185_v26 = vld [vmem:[#allocation4 + $0x140] sm:$0xff]  ;;  %v2188_v27 = vld [vmem:[#allocation4 + $0x168] sm:$0xff]  ;;  %v2193_v28 = vld [vmem:[#allocation4 + $0x178] sm:$0xff] }
  0x16   :  { %399 = vmatpush.msra.mxu1 %v2136_v13  ;;  %439 = vmatpush.msra.mxu3 %v2143_v16  ;;  %v2195_v29 = vld [vmem:[#allocation4 + $0x120] sm:$0xff]  ;;  %v2202_v30 = vld [vmem:[%s3191_s0 + $0x38] sm:$0xff]  ;;  %v2207_v31 = vld [vmem:[%s3191_s0 + $0x10] sm:$0xff] }
  0x17   :  { %381 = vmatpush.msrb.mxu2 %v2139_v14  ;;  %531 = vmatpush.msrb.mxu0 %v2122_v9  ;;  %v2211_v32 = vld [vmem:[#allocation4 + $0x100] sm:$0xff]  ;;  %v2213_v33 = vld [vmem:[#allocation4 + $0x148] sm:$0xff]  ;;  %v2220_v34 = vld [vmem:[#allocation4 + $0x158] sm:$0xff] }
  0x18   :  { %400 = vmatpush.msra.mxu1 %v2141_v15  ;;  %440 = vmatpush.msra.mxu3 %v2158_v19  ;;  %3298 = vst [vmem:[#allocation13_spill] sm:$0xff] %v2213_v33  ;;  %v2226_v35 = vld [vmem:[#allocation4 + $0xe0] sm:$0xff]  ;;  %v2228_v36 = vld [vmem:[#allocation4 + $0x128] sm:$0xff]  ;;  %v2232_v37 = vld [vmem:[#allocation4 + $0x138] sm:$0xff] }
  0x19   :  { %1696 = vmatmul.msk.f32.vlgmr.msrb.gmra.mxu1 %vm88_vm0, %v2112_v6  ;;  %1694 = vmatmul.msk.f32.gmra.mxu3 %vm88_vm0, %v2150_v17  ;;  %v2234_v38 = vld [vmem:[#allocation4 + $0xc0] sm:$0xff]  ;;  %v2237_v39 = vld [vmem:[#allocation4 + $0x108] sm:$0xff]  ;;  %v2242_v40 = vld [vmem:[#allocation4 + $0x118] sm:$0xff] }
  0x1a   :  { %1705 = vmatmul.msk.f32.gmra.mxu2 %vm88_vm0, %v2155_v18  ;;  %401 = vmatpush.msra.mxu1 %v2166_v21  ;;  %v2244_v41 = vld [vmem:[#allocation4 + $0xa0] sm:$0xff]  ;;  %v2252_v42 = vld [vmem:[%s3191_s0 + $0x18] sm:$0xff]  ;;  %v2258_v44 = vld [vmem:[#allocation4 + $0xe8] sm:$0xff] }
  0x1b   :  { %382 = vmatpush.msrb.mxu2 %v2163_v20  ;;  %441 = vmatpush.msra.mxu3 %v2171_v22  ;;  %3299 = vst [vmem:[#allocation14_spill] sm:$0xff] %v2244_v41  ;;  %v2256_v43 = vld [vmem:[#allocation4 + $0x80] sm:$0xff]  ;;  %v2271_v46 = vld [vmem:[#allocation4 + $0xc8] sm:$0xff]  ;;  %v2273_v47 = vld [vmem:[#allocation4 + $0xf8] sm:$0xff] }
  0x1c   :  { %402 = vmatpush.msra.mxu1 %v2179_v24  ;;  %532 = vmatpush.msrb.mxu0 %v2134_v12  ;;  %3300 = vst [vmem:[#allocation15_spill] sm:$0xff] %v2256_v43  ;;  %v2269_v45 = vld [vmem:[#allocation4 + $0x60] sm:$0xff]  ;;  %v2277_v48 = vld [vmem:[#allocation4 + $0xd8] sm:$0xff]  ;;  %v2282_v50 = vld [vmem:[#allocation4 + $0xa8] sm:$0xff] }
  0x1d   :  { %383 = vmatpush.msrb.mxu2 %v2177_v23  ;;  %442 = vmatpush.msra.mxu3 %v2183_v25  ;;  %3301 = vst [vmem:[#allocation16_spill] sm:$0xff] %v2269_v45  ;;  %v2279_v49 = vld [vmem:[#allocation4 + $0x40] sm:$0xff]  ;;  %v2295_v53 = vld [vmem:[#allocation4 + $0x88] sm:$0xff]  ;;  %v2301_v54 = vld [vmem:[#allocation4 + $0x1f0] sm:$0xff] }
  0x1e   :  { %403 = vmatpush.msra.mxu1 %v2188_v27  ;;  %533 = vmatpush.msrb.mxu0 %v2139_v14  ;;  %3302 = vst [vmem:[#allocation17_spill] sm:$0xff] %v2279_v49  ;;  %v2287_v51 = vld [vmem:[#allocation4 + $0x20] sm:$0xff]  ;;  %v2307_v55 = vld [vmem:[#allocation4 + $0xb8] sm:$0xff]  ;;  %v2309_v56 = vld [vmem:[#allocation4 + $0x68] sm:$0xff] }
  0x1f   :  { %384 = vmatpush.msrb.mxu2 %v2185_v26  ;;  %443 = vmatpush.msra.mxu3 %v2193_v28  ;;  %3303 = vst [vmem:[#allocation18_spill] sm:$0xff] %v2282_v50  ;;  %v2293_v52 = vld [vmem:[#allocation4] sm:$0xff]  ;;  %v2312_v57 = vld [vmem:[#allocation4 + $0x1d0] sm:$0xff]  ;;  %v2315_v58 = vld [vmem:[#allocation4 + $0x98] sm:$0xff] }
  0x20   :  { %404 = vmatpush.msra.mxu1 %v2213_v33  ;;  %534 = vmatpush.msrb.mxu0 %v2163_v20  ;;  %3304 = vst [vmem:[#allocation19_spill] sm:$0xff] %v2287_v51  ;;  %v2319_v59 = vld [vmem:[#allocation4 + $0x48] sm:$0xff]  ;;  %v2321_v60 = vld [vmem:[#allocation4 + $0x1b0] sm:$0xff]  ;;  %v2346_v1 = vld [vmem:[#allocation4 + $0x78] sm:$0xff] }
  0x21   :  { %1697 = vmatmul.msk.f32.gmra.mxu1 %vm88_vm0, %v2155_v18  ;;  %385 = vmatpush.msrb.mxu2 %v2195_v29  ;;  %3305 = vst [vmem:[#allocation20_spill] sm:$0xff] %v2293_v52  ;;  %v2331_v61 = vld [vmem:[#allocation4 + $0x190] sm:$0xff]  ;;  %v2333_v62 = vld [vmem:[#allocation4 + $0x28] sm:$0xff]  ;;  %v2350_v2 = vld [vmem:[#allocation4 + $0x58] sm:$0xff] }
  0x22   :  { %1695 = vmatmul.msk.f32.gmra.mxu3 %vm88_vm0, %v2202_v30  ;;  %1706 = vmatmul.msk.f32.gmra.mxu2 %vm88_vm0, %v2207_v31  ;;  %3306 = vst [vmem:[#allocation21_spill] sm:$0xff] %v2295_v53  ;;  %v2342_v63 = vld [vmem:[#allocation4 + $0x170] sm:$0xff]  ;;  %v2344_v0 = vld [vmem:[#allocation4 + $0x8] sm:$0xff]  ;;  %v2378_v10 = vld [vmem:[#allocation4 + $0x38] sm:$0xff] }
  0x23   :  { %386 = vmatpush.msrb.mxu2 %v2211_v32  ;;  %444 = vmatpush.msra.mxu3 %v2220_v34  ;;  %3307 = vst [vmem:[#allocation22_spill] sm:$0xff] %v2307_v55  ;;  %v2352_v3 = vld [vmem:[#allocation4 + $0x150] sm:$0xff]  ;;  %v2380_v11 = vld [vmem:[#allocation4 + $0x18] sm:$0xff] }
  0x24   :  { %405 = vmatpush.msra.mxu1 %v2228_v36  ;;  %1689 = vmatmul.msk.f32.gmra.mxu0 %vm88_vm0, %v2155_v18  ;;  %3308 = vst [vmem:[#allocation23_spill] sm:$0xff] %v2309_v56  ;;  %v2364_v7 = vld [vmem:[#allocation4 + $0x110] sm:$0xff] }
  0x25   :  { %387 = vmatpush.msrb.mxu2 %v2226_v35  ;;  %445 = vmatpush.msra.mxu3 %v2232_v37  ;;  %3309 = vst [vmem:[#allocation24_spill] sm:$0xff] %v2315_v58  ;;  %v2376_v8 = vld [vmem:[#allocation4 + $0xf0] sm:$0xff] }
  0x26   :  { %406 = vmatpush.msra.mxu1 %v2237_v39  ;;  %535 = vmatpush.msrb.mxu0 %v2177_v23  ;;  %3310 = vst [vmem:[#allocation25_spill] sm:$0xff] %v2319_v59 }
  0x27   :  { %388 = vmatpush.msrb.mxu2 %v2234_v38  ;;  %446 = vmatpush.msra.mxu3 %v2242_v40  ;;  %3311 = vst [vmem:[#allocation26_spill] sm:$0xff] %v2333_v62 }
  0x28   :  { %407 = vmatpush.msra.mxu1 %v2258_v44  ;;  %536 = vmatpush.msrb.mxu0 %v2185_v26  ;;  %3312 = vst [vmem:[#allocation27_spill] sm:$0xff] %v2344_v0 }
  0x29   :  { %1698 = vmatmul.msk.f32.gmra.mxu1 %vm88_vm0, %v2207_v31  ;;  %389 = vmatpush.msrb.mxu2 %v2244_v41  ;;  %3313 = vst [vmem:[#allocation28_spill] sm:$0xff] %v2346_v1 }
  0x2a   :  { %1707 = vmatmul.msk.f32.gmra.mxu2 %vm88_vm0, %v2252_v42  ;;  %1712 = vmatmul.msk.f32.vlgmr.msrb.gmra.mxu3 %vm88_vm0, %v2112_v6  ;;  %3314 = vst [vmem:[#allocation29_spill] sm:$0xff] %v2350_v2  ;;  %v2358_v6 = vld [vmem:[#allocation4 + $0x130] sm:$0xff] }
  0x2b   :  { %390 = vmatpush.msrb.mxu2 %v2256_v43  ;;  %447 = vmatpush.msra.mxu3 %v2273_v47  ;;  %3315 = vst [vmem:[#allocation30_spill] sm:$0xff] %v2378_v10 }
  0x2c   :  { %408 = vmatpush.msra.mxu1 %v2271_v46  ;;  %537 = vmatpush.msrb.mxu0 %v2195_v29  ;;  %3316 = vst [vmem:[#allocation31_spill] sm:$0xff] %v2380_v11 }
  0x2d   :  { %391 = vmatpush.msrb.mxu2 %v2269_v45  ;;  %448 = vmatpush.msra.mxu3 %v2277_v48 }
  0x2e   :  { %409 = vmatpush.msra.mxu1 %v2282_v50  ;;  %538 = vmatpush.msrb.mxu0 %v2211_v32 }
  0x2f   :  { %392 = vmatpush.msrb.mxu2 %v2279_v49  ;;  %449 = vmatpush.msra.mxu3 %v2307_v55 }
  0x30   :  { %410 = vmatpush.msra.mxu1 %v2295_v53  ;;  %1690 = vmatmul.msk.f32.gmra.mxu0 %vm88_vm0, %v2207_v31 }
  0x31   :  { %1699 = vmatmul.msk.f32.gmra.mxu1 %vm88_vm0, %v2252_v42  ;;  %393 = vmatpush.msrb.mxu2 %v2287_v51 }
  0x32   :  { %1708 = vmatmul.msk.f32.gmra.mxu2 %vm88_vm0, %v2102_v4  ;;  %1713 = vmatmul.msk.f32.gmra.mxu3 %vm88_vm0, %v2155_v18  ;;  %v2384_v18 = vld [vmem:[#allocation4 + $0xd0] sm:$0xff] }
  0x33   :  { %394 = vmatpush.msrb.mxu2 %v2293_v52  ;;  %411 = vmatpush.msra.mxu1 %v2309_v56 }
  0x34   :  { %450 = vmatpush.msra.mxu3 %v2315_v58  ;;  %539 = vmatpush.msrb.mxu0 %v2226_v35 }
  0x35   :  { %419 = vmatpush.msra.mxu2 %v2301_v54  ;;  %412 = vmatpush.msra.mxu1 %v2319_v59 }
  0x36   :  { %540 = vmatpush.msrb.mxu0 %v2234_v38  ;;  %451 = vmatpush.msra.mxu3 %v2346_v1 }
  0x37   :  { %420 = vmatpush.msra.mxu2 %v2312_v57  ;;  %413 = vmatpush.msra.mxu1 %v2333_v62 }
  0x38   :  { %541 = vmatpush.msrb.mxu0 %v2244_v41  ;;  %452 = vmatpush.msra.mxu3 %v2350_v2 }
  0x39   :  { %421 = vmatpush.msra.mxu2 %v2321_v60  ;;  %1700 = vmatmul.msk.f32.gmra.mxu1 %vm88_vm0, %v2102_v4 }
  0x3a   :  { %1709 = vmatmul.msk.f32.gmra.mxu2 %vm88_vm0, %v2107_v5  ;;  %1714 = vmatmul.msk.f32.gmra.mxu3 %vm88_vm0, %v2207_v31  ;;  %v2390_v31 = vld [vmem:[#allocation4 + $0xb0] sm:$0xff] }
  0x3b   :  { %422 = vmatpush.msra.mxu2 %v2331_v61  ;;  %414 = vmatpush.msra.mxu1 %v2344_v0  ;;  %3317 = vst [vmem:[#allocation32_spill] sm:$0xff] %v2390_v31 }
  0x3c   :  { %542 = vmatpush.msrb.mxu0 %v2256_v43  ;;  %453 = vmatpush.msra.mxu3 %v2378_v10  ;;  %v2417_v43 = vld [vmem:[#allocation4 + $0x30] sm:$0xff] }
  0x3d   :  { %423 = vmatpush.msra.mxu2 %v2342_v63  ;;  %551 = vmatpush.msrb.mxu1 %v2136_v13  ;;  %3321 = vst [vmem:[#allocation36_spill] sm:$0xff] %v2417_v43 }
  0x3e   :  { %1691 = vmatmul.msk.f32.gmra.mxu0 %vm88_vm0, %v2252_v42  ;;  %454 = vmatpush.msra.mxu3 %v2380_v11 }
  0x3f   :  { %424 = vmatpush.msra.mxu2 %v2352_v3  ;;  %552 = vmatpush.msrb.mxu1 %v2141_v15 }
  0x40   :  { %543 = vmatpush.msrb.mxu0 %v2269_v45  ;;  %591 = vmatpush.msrb.mxu3 %v2143_v16  ;;  %v2407_v45 = vld [vmem:[#allocation4 + $0x70] sm:$0xff] }
  0x41   :  { %1701 = vmatmul.msk.f32.gmra.mxu1 %vm88_vm0, %v2107_v5  ;;  %425 = vmatpush.msra.mxu2 %v2358_v6  ;;  %3319 = vst [vmem:[#allocation34_spill] sm:$0xff] %v2407_v45 }
  0x42   :  { %1710 = vmatmul.msk.f32.gmra.mxu2 %vm88_vm0, %v2150_v17  ;;  %1715 = vmatmul.msk.f32.gmra.mxu3 %vm88_vm0, %v2252_v42  ;;  %v2396_v42 = vld [vmem:[#allocation4 + $0x90] sm:$0xff] }
  0x43   :  { %426 = vmatpush.msra.mxu2 %v2364_v7  ;;  %553 = vmatpush.msrb.mxu1 %v2166_v21  ;;  %3318 = vst [vmem:[#allocation33_spill] sm:$0xff] %v2396_v42 }
  0x44   :  { %544 = vmatpush.msrb.mxu0 %v2279_v49  ;;  %592 = vmatpush.msrb.mxu3 %v2158_v19  ;;  %v2411_v49 = vld [vmem:[#allocation4 + $0x50] sm:$0xff] }
  0x45   :  { %427 = vmatpush.msra.mxu2 %v2376_v8  ;;  %554 = vmatpush.msrb.mxu1 %v2179_v24  ;;  %3320 = vst [vmem:[#allocation35_spill] sm:$0xff] %v2411_v49 }
  0x46   :  { %593 = vmatpush.msrb.mxu3 %v2171_v22  ;;  %545 = vmatpush.msrb.mxu0 %v2287_v51 }
  0x47   :  { %428 = vmatpush.msra.mxu2 %v2384_v18  ;;  %555 = vmatpush.msrb.mxu1 %v2188_v27 }
  0x48   :  { %594 = vmatpush.msrb.mxu3 %v2183_v25  ;;  %546 = vmatpush.msrb.mxu0 %v2293_v52 }
  0x49   :  { %1702 = vmatmul.msk.f32.gmra.mxu1 %vm88_vm0, %v2150_v17  ;;  %429 = vmatpush.msra.mxu2 %v2390_v31 }
  0x4a   :  { %1711 = vmatmul.msk.f32.gmra.mxu2 %vm88_vm0, %v2202_v30  ;;  %1716 = vmatmul.msk.f32.gmra.mxu3 %vm88_vm0, %v2102_v4  ;;  %v373_v4 = vld [vmem:[%s3192_s1] sm:$0xff] }
  0x4b   :  { %430 = vmatpush.msra.mxu2 %v2396_v42  ;;  %556 = vmatpush.msrb.mxu1 %v2213_v33  ;;  %v2426_v33 = vld [vmem:[#allocation4 + $0x10] sm:$0xff] }
  0x4c   :  { %595 = vmatpush.msrb.mxu3 %v2193_v28  ;;  %3322 = vst [vmem:[#allocation37_spill] sm:$0xff] %v2426_v33  ;;  %683 = vmatpush.msra.mxu0 %v2122_v9 }
  0x4d   :  { %431 = vmatpush.msra.mxu2 %v2407_v45  ;;  %557 = vmatpush.msrb.mxu1 %v2228_v36 }
  0x4e   :  { %596 = vmatpush.msrb.mxu3 %v2220_v34  ;;  %684 = vmatpush.msra.mxu0 %v2134_v12 }
  0x4f   :  { %432 = vmatpush.msra.mxu2 %v2411_v49  ;;  %558 = vmatpush.msrb.mxu1 %v2237_v39 }
  0x50   :  { %597 = vmatpush.msrb.mxu3 %v2232_v37  ;;  %685 = vmatpush.msra.mxu0 %v2139_v14 }
  0x51   :  { %1703 = vmatmul.msk.f32.gmra.mxu1 %vm88_vm0, %v2202_v30  ;;  %433 = vmatpush.msra.mxu2 %v2417_v43 }
  0x52   :  { %1717 = vmatmul.msk.f32.gmra.mxu3 %vm88_vm0, %v2107_v5  ;;  %395 = vmatmul.f32.vlgmr.msrb.gmra.mxu2 %v373_v4  ;;  %v3323_v5 = vld [vmem:[#allocation13_spill] sm:$0xff] }
  0x53   :  { %434 = vmatpush.msra.mxu2 %v2426_v33  ;;  %559 = vmatpush.msrb.mxu1 %v2258_v44 }
  0x54   :  { %598 = vmatpush.msrb.mxu3 %v2242_v40  ;;  %686 = vmatpush.msra.mxu0 %v2163_v20 }
  0x55   :  { %571 = vmatpush.msrb.mxu2 %v2301_v54  ;;  %560 = vmatpush.msrb.mxu1 %v2271_v46 }
  0x56   :  { %599 = vmatpush.msrb.mxu3 %v2273_v47  ;;  %687 = vmatpush.msra.mxu0 %v2177_v23 }
  0x57   :  { %572 = vmatpush.msrb.mxu2 %v2312_v57  ;;  %561 = vmatpush.msrb.mxu1 %v2282_v50 }
  0x58   :  { %600 = vmatpush.msrb.mxu3 %v2277_v48  ;;  %688 = vmatpush.msra.mxu0 %v2185_v26 }
  0x59   :  { %573 = vmatpush.msrb.mxu2 %v2321_v60  ;;  %415 = vmatmul.f32.vlgmr.msra.gmra.mxu1 %v373_v4 }
  0x5a   :  { %1718 = vmatmul.msk.f32.gmra.mxu3 %vm88_vm0, %v2150_v17  ;;  %435 = vmatmul.f32.vlgmr.msra.gmra.mxu2 %v373_v4  ;;  %v3324_v17 = vld [vmem:[#allocation15_spill] sm:$0xff] }
  0x5b   :  { %574 = vmatpush.msrb.mxu2 %v2331_v61  ;;  %562 = vmatpush.msrb.mxu1 %v2295_v53 }
  0x5c   :  { %601 = vmatpush.msrb.mxu3 %v2307_v55  ;;  %689 = vmatpush.msra.mxu0 %v2195_v29 }
  0x5d   :  { %575 = vmatpush.msrb.mxu2 %v2342_v63  ;;  %563 = vmatpush.msrb.mxu1 %v2309_v56 }
  0x5e   :  { %602 = vmatpush.msrb.mxu3 %v2315_v58  ;;  %690 = vmatpush.msra.mxu0 %v2211_v32 }
  0x5f   :  { %576 = vmatpush.msrb.mxu2 %v2352_v3  ;;  %564 = vmatpush.msrb.mxu1 %v2319_v59 }
  0x60   :  { %603 = vmatpush.msrb.mxu3 %v2346_v1  ;;  %691 = vmatpush.msra.mxu0 %v2226_v35 }
  0x61   :  { %577 = vmatpush.msrb.mxu2 %v2358_v6  ;;  %565 = vmatpush.msrb.mxu1 %v2333_v62 }
  0x62   :  { %1719 = vmatmul.msk.f32.gmra.mxu3 %vm88_vm0, %v2202_v30  ;;  %692 = vmatpush.msra.mxu0 %v2234_v38  ;;  %v3325_v30 = vld [vmem:[#allocation16_spill] sm:$0xff] }
  0x63   :  { %578 = vmatpush.msrb.mxu2 %v2364_v7  ;;  %604 = vmatpush.msrb.mxu3 %v2350_v2 }
  0x64   :  { %566 = vmatpush.msrb.mxu1 %v2344_v0  ;;  %693 = vmatpush.msra.mxu0 %v2244_v41 }
  0x65   :  { %579 = vmatpush.msrb.mxu2 %v2376_v8  ;;  %605 = vmatpush.msrb.mxu3 %v2378_v10 }
  0x66   :  { %703 = vmatpush.msra.mxu1 %v2136_v13  ;;  %694 = vmatpush.msra.mxu0 %v3324_v17 }
  0x67   :  { %580 = vmatpush.msrb.mxu2 %v2384_v18  ;;  %606 = vmatpush.msrb.mxu3 %v2380_v11 }
  0x68   :  { %704 = vmatpush.msra.mxu1 %v2141_v15  ;;  %695 = vmatpush.msra.mxu0 %v3325_v30 }
  0x69   :  { %581 = vmatpush.msrb.mxu2 %v2390_v31 }
  0x6a   :  { %455 = vmatmul.f32.vlgmr.msra.gmra.mxu3 %v373_v4  ;;  %705 = vmatpush.msra.mxu1 %v2166_v21  ;;  %v3326_v4 = vld [vmem:[#allocation17_spill] sm:$0xff] }
  0x6b   :  { %582 = vmatpush.msrb.mxu2 %v2396_v42  ;;  %743 = vmatpush.msra.mxu3 %v2143_v16 }
  0x6c   :  { %706 = vmatpush.msra.mxu1 %v2179_v24  ;;  %696 = vmatpush.msra.mxu0 %v3326_v4 }
  0x6d   :  { %583 = vmatpush.msrb.mxu2 %v2407_v45  ;;  %744 = vmatpush.msra.mxu3 %v2158_v19 }
  0x6e   :  { %707 = vmatpush.msra.mxu1 %v2188_v27  ;;  %697 = vmatpush.msra.mxu0 %v2287_v51 }
  0x6f   :  { %584 = vmatpush.msrb.mxu2 %v2411_v49  ;;  %745 = vmatpush.msra.mxu3 %v2171_v22 }
  0x70   :  { %708 = vmatpush.msra.mxu1 %v3323_v5  ;;  %698 = vmatpush.msra.mxu0 %v2293_v52 }
  0x71   :  { %585 = vmatpush.msrb.mxu2 %v2417_v43  ;;  %746 = vmatpush.msra.mxu3 %v2183_v25 }
  0x72   :  { %709 = vmatpush.msra.mxu1 %v2228_v36 }
  0x73   :  { %586 = vmatpush.msrb.mxu2 %v2426_v33  ;;  %747 = vmatpush.msra.mxu3 %v2193_v28 }
  0x74   :  { %710 = vmatpush.msra.mxu1 %v2237_v39 }
  0x75   :  { %723 = vmatpush.msra.mxu2 %v2301_v54  ;;  %748 = vmatpush.msra.mxu3 %v2220_v34 }
  0x76   :  { %711 = vmatpush.msra.mxu1 %v2258_v44 }
  0x77   :  { %724 = vmatpush.msra.mxu2 %v2312_v57  ;;  %749 = vmatpush.msra.mxu3 %v2232_v37 }
  0x78   :  { %712 = vmatpush.msra.mxu1 %v2271_v46 }
  0x79   :  { %725 = vmatpush.msra.mxu2 %v2321_v60  ;;  %750 = vmatpush.msra.mxu3 %v2242_v40 }
  0x7a   :  { %713 = vmatpush.msra.mxu1 %v2282_v50 }
  0x7b   :  { %726 = vmatpush.msra.mxu2 %v2331_v61  ;;  %751 = vmatpush.msra.mxu3 %v2273_v47 }
  0x7c   :  { %714 = vmatpush.msra.mxu1 %v2295_v53 }
  0x7d   :  { %727 = vmatpush.msra.mxu2 %v2342_v63  ;;  %752 = vmatpush.msra.mxu3 %v2277_v48 }
  0x7e   :  { %715 = vmatpush.msra.mxu1 %v2309_v56 }
  0x7f   :  { %728 = vmatpush.msra.mxu2 %v2352_v3  ;;  %753 = vmatpush.msra.mxu3 %v2307_v55 }
  0x80   :  { %716 = vmatpush.msra.mxu1 %v2319_v59 }
  0x81   :  { %729 = vmatpush.msra.mxu2 %v2358_v6  ;;  %754 = vmatpush.msra.mxu3 %v2315_v58 }
  0x82   :  { %717 = vmatpush.msra.mxu1 %v2333_v62 }
  0x83   :  { %730 = vmatpush.msra.mxu2 %v2364_v7  ;;  %755 = vmatpush.msra.mxu3 %v2346_v1 }
  0x84   :  { %718 = vmatpush.msra.mxu1 %v2344_v0 }
  0x85   :  { %731 = vmatpush.msra.mxu2 %v2376_v8  ;;  %756 = vmatpush.msra.mxu3 %v2350_v2 }
  0x87   :  { %732 = vmatpush.msra.mxu2 %v2384_v18  ;;  %757 = vmatpush.msra.mxu3 %v2378_v10 }
  0x89   :  { %733 = vmatpush.msra.mxu2 %v2390_v31  ;;  %758 = vmatpush.msra.mxu3 %v2380_v11  ;;  %v78_v11 = vld [vmem:[%s3196_s5] sm:$0xf] }
  0x8a   :  { %v2547_v51 = vperm.slane %v78_v11, 2  ;;  %v81_v2 = vperm.slane %v78_v11, 1 }
  0x8b   :  { %734 = vmatpush.msra.mxu2 %v2396_v42 }
  0x8d   :  { %735 = vmatpush.msra.mxu2 %v2407_v45  ;;  %v2535_v52 = vpop.f32.mrf.mxu1 }
  0x8e   :  { %3327 = vst [vmem:[#allocation13_spill] sm:$0xff] %v2535_v52 }
  0x8f   :  { %736 = vmatpush.msra.mxu2 %v2411_v49 }
  0x91   :  { %737 = vmatpush.msra.mxu2 %v2417_v43 }
  0x93   :  { %738 = vmatpush.msra.mxu2 %v2426_v33 }
  0x94   :  { %v2540_v0 = vpop.f32.mrf.mxu3  ;;  %v2542_v62 = vpop.f32.mrf.mxu2 }
  0x95   :  { %3328 = vst [vmem:[#allocation38_spill] sm:$0xff] %v2540_v0 }
  0x96   :  { %v171_v10 = vpop.f32.mrf.mxu1 }
  0x9c   :  { %v2549_v59 = vpop.f32.mrf.mxu3 }
  0x9d   :  { %3329 = vst [vmem:[#allocation39_spill] sm:$0xff] %v2549_v59  ;;  %v215_v52 = vpop.f32.mrf.mxu2 }
  0x9e   :  { %v2552_v49 = vadd.f32 %v215_v52, %v2547_v51  ;;  %v174_v43 = vpop.f32.mrf.mxu1 }
  0x9f   :  { %v2554_v33 = vadd.f32 %v174_v43, %v81_v2 }
  0xa0   :  { %3330 = vst [vmem:[#allocation40_spill] sm:$0xff] %v2552_v49  ;;  %v83_v49 = vperm.slane %v78_v11, 3 }
  0xa1   :  { %3331 = vst [vmem:[#allocation41_spill] sm:$0xff] %v2554_v33 }
  0xa5   :  { %v2556_v0 = vpop.f32.mrf.mxu3  ;;  %v218_v4 = vpop.f32.mrf.mxu2 }
  0xa6   :  { %3332 = vst [vmem:[#allocation42_spill] sm:$0xff] %v2556_v0  ;;  %v2559_v1 = vadd.f32 %v218_v4, %v2547_v51  ;;  %v177_v45 = vpop.f32.mrf.mxu1 }
  0xa7   :  { %v2561_v56 = vadd.f32 %v177_v45, %v81_v2 }
  0xa8   :  { %3333 = vst [vmem:[#allocation43_spill] sm:$0xff] %v2559_v1 }
  0xa9   :  { %3334 = vst [vmem:[#allocation44_spill] sm:$0xff] %v2561_v56 }
  0xad   :  { %v221_v30 = vpop.f32.mrf.mxu2  ;;  %v253_v58 = vpop.f32.mrf.mxu3 }
  0xae   :  { %v2564_v59 = vadd.f32 %v221_v30, %v2547_v51  ;;  %v180_v42 = vpop.f32.mrf.mxu1 }
  0xaf   :  { %v2566_v52 = vadd.f32 %v180_v42, %v81_v2 }
  0xb0   :  { %3335 = vst [vmem:[#allocation45_spill] sm:$0xff] %v2564_v59 }
  0xb1   :  { %3336 = vst [vmem:[#allocation46_spill] sm:$0xff] %v2566_v52 }
  0xb5   :  { %v224_v43 = vpop.f32.mrf.mxu2  ;;  %v256_v33 = vpop.f32.mrf.mxu3 }
  0xb6   :  { %v2569_v0 = vadd.f32 %v224_v43, %v2547_v51  ;;  %v2571_v53 = vadd.f32 %v256_v33, %v83_v49  ;;  %v183_v4 = vpop.f32.mrf.mxu1 }
  0xb7   :  { %v2573_v1 = vadd.f32 %v183_v4, %v81_v2 }
  0xb8   :  { %3337 = vst [vmem:[#allocation47_spill] sm:$0xff] %v2569_v0 }
  0xb9   :  { %3338 = vst [vmem:[#allocation48_spill] sm:$0xff] %v2571_v53 }
  0xba   :  { %3339 = vst [vmem:[#allocation49_spill] sm:$0xff] %v2573_v1 }
  0xbd   :  { %v227_v45 = vpop.f32.mrf.mxu2  ;;  %v259_v56 = vpop.f32.mrf.mxu3 }
  0xbe   :  { %v2576_v17 = vadd.f32 %v227_v45, %v2547_v51  ;;  %v2578_v30 = vadd.f32 %v259_v56, %v83_v49  ;;  %v186_v42 = vpop.f32.mrf.mxu1 }
  0xbf   :  { %v2580_v59 = vadd.f32 %v186_v42, %v81_v2 }
  0xc0   :  { %3340 = vst [vmem:[#allocation50_spill] sm:$0xff] %v2576_v17 }
  0xc1   :  { %3341 = vst [vmem:[#allocation51_spill] sm:$0xff] %v2578_v30  ;;  %v2596_v30 = vperm.slane %v78_v11, 0 }
  0xc2   :  { %3342 = vst [vmem:[#allocation52_spill] sm:$0xff] %v2580_v59  ;;  %v130_v59 = vpop.f32.mrf.mxu0 }
  0xc3   :  { %3349 = vst [vmem:[#allocation59_spill] sm:$0xff] %v2596_v30 }
  0xc5   :  { %v230_v52 = vpop.f32.mrf.mxu2  ;;  %v262_v55 = vpop.f32.mrf.mxu3 }
  0xc6   :  { %v2583_v43 = vadd.f32 %v230_v52, %v2547_v51  ;;  %v2585_v33 = vadd.f32 %v262_v55, %v83_v49  ;;  %v189_v0 = vpop.f32.mrf.mxu1  ;;  %v131_v52 = vadd.f32 %v130_v59, %v2596_v30  ;;  %v172_v55 = vadd.f32 %v171_v10, %v81_v2 }
  0xc7   :  { %v2587_v4 = vadd.f32 %v189_v0, %v81_v2 }
  0xc8   :  { %3343 = vst [vmem:[#allocation53_spill] sm:$0xff] %v2583_v43 }
  0xc9   :  { %3344 = vst [vmem:[#allocation54_spill] sm:$0xff] %v2585_v33 }
  0xca   :  { %3345 = vst [vmem:[#allocation55_spill] sm:$0xff] %v2587_v4 }
  0xcd   :  { %v233_v1 = vpop.f32.mrf.mxu2  ;;  %v265_v53 = vpop.f32.mrf.mxu3 }
  0xce   :  { %v2590_v45 = vadd.f32 %v233_v1, %v2547_v51  ;;  %v2592_v56 = vadd.f32 %v265_v53, %v83_v49  ;;  %v192_v17 = vpop.f32.mrf.mxu1 }
  0xcf   :  { %v2594_v42 = vadd.f32 %v192_v17, %v81_v2 }
  0xd0   :  { %3346 = vst [vmem:[#allocation56_spill] sm:$0xff] %v2590_v45 }
  0xd1   :  { %3347 = vst [vmem:[#allocation57_spill] sm:$0xff] %v2592_v56 }
  0xd2   :  { %3348 = vst [vmem:[#allocation58_spill] sm:$0xff] %v2594_v42 }
  0xd5   :  { %v268_v43 = vpop.f32.mrf.mxu3  ;;  %v396_v33 = vpop.f32.mrf.mxu2 }
  0xd6   :  { %v2599_v0 = vadd.f32 %v268_v43, %v83_v49  ;;  %v459_v4 = vadd.f32 %v396_v33, %v131_v52  ;;  %v416_v31 = vpop.f32.mrf.mxu1 }
  0xd7   :  { %v460_v50 = vadd.f32 %v416_v31, %v172_v55 }
  0xd8   :  { %3350 = vst [vmem:[#allocation60_spill] sm:$0xff] %v2599_v0  ;;  %v1720_v1 = vmul.f32 -1.442695, %v459_v4  ;;  %v254_v4 = vadd.f32 %v253_v58, %v83_v49 }
  0xd9   :  { %v1721_v45 = vmul.f32 -1.442695, %v460_v50 }
  0xda   :  { %1756 = vpow2.f32 %v1720_v1 }
  0xdb   :  { %1758 = vpow2.f32 %v1721_v45 }
  0xdd   :  { %v271_v53 = vpop.f32.mrf.mxu3 }
  0xde   :  { %v2601_v17 = vadd.f32 %v271_v53, %v83_v49 }
  0xe0   :  { %3351 = vst [vmem:[#allocation61_spill] sm:$0xff] %v2601_v17  ;;  %v1757_v42 = vpop.eup %1756  ;;  %v436_v17 = vpop.f32.mrf.mxu2 }
  0xe1   :  { %v1759_v11 = vpop.eup %1758  ;;  %v466_v56 = vadd.f32 1.0, %v1757_v42  ;;  %v213_v42 = vadd.f32 %v2542_v62, %v2547_v51 }
  0xe2   :  { %v485_v41 = vadd.f32 1.0, %v1759_v11 }
  0xe3   :  { %1760 = vrcp.f32 %v466_v56  ;;  %vm472_vm1 = vweird.f32 %v466_v56  ;;  %v478_v30 = vand.u32 2147483648, %v466_v56 }
  0xe4   :  { %1762 = vrcp.f32 %v485_v41  ;;  %vm491_vm4 = vweird.f32 %v485_v41 }
  0xe5   :  { %v274_v59 = vpop.f32.mrf.mxu3  ;;  %v479_v62 = vor.u32 1.1754944e-38, %v478_v30 }
  0xe6   :  { %v2603_v2 = vadd.f32 %v274_v59, %v83_v49  ;;  %v497_v59 = vand.u32 2147483648, %v485_v41 }
  0xe8   :  { %3352 = vst [vmem:[#allocation62_spill] sm:$0xff] %v2603_v2  ;;  %v461_v2 = vadd.f32 %v436_v17, %v213_v42  ;;  %v498_v51 = vor.u32 1.1754944e-38, %v497_v59 }
  0xe9   :  { %v1761_v10 = vpop.eup %1760 }
  0xea   :  { %v1763_v43 = vpop.eup %1762  ;;  %v468_v33 = vmul.f32 %v1761_v10, %v466_v56  ;;  %vm473_vm2 = vweird.f32 %v1761_v10 }
  0xeb   :  { %v487_v31 = vmul.f32 %v1763_v43, %v485_v41  ;;  %vm492_vm3 = vweird.f32 %v1763_v43  ;;  %vm2607_vm5 = vmor %vm472_vm1, %vm473_vm2 }
  0xec   :  { %v469_v50 = vsub.f32 1.0, %v468_v33  ;;  %v476_v33 = vand.u32 2147483647, %v466_v56  ;;  %vm493_vm6 = vmor %vm491_vm4, %vm492_vm3 }
  0xed   :  { %v488_v52 = vsub.f32 1.0, %v487_v31  ;;  %v456_v45 = vpop.f32.mrf.mxu3  ;;  %v495_v31 = vand.u32 2147483647, %v485_v41 }
  0xee   :  { %v462_v55 = vadd.f32 %v456_v45, %v254_v4  ;;  %v470_v0 = vmul.f32 %v1761_v10, %v469_v50  ;;  %vm477_vm7 = vcmp.eq.f32.partialorder %v476_v33, 8.507059e+37 }
  0xef   :  { %v489_v1 = vmul.f32 %v1763_v43, %v488_v52  ;;  %vm496_vm8 = vcmp.eq.f32.partialorder %v495_v31, 8.507059e+37 }
  0xf0   :  { %v1722_v53 = vmul.f32 -1.442695, %v462_v55  ;;  %v471_v49 = vadd.f32 %v1761_v10, %v470_v0  ;;  %v374_v0 = vld [vmem:[%s3193_s2] sm:$0xff] }
  0xf1   :  { %v490_v11 = vadd.f32 %v1763_v43, %v489_v1 }
  0xf2   :  { %1764 = vpow2.f32 %v1722_v53  ;;  %v475_v52 = vsel %vm2607_vm5, %v1761_v10, %v471_v49 }
  0xf3   :  { %v494_v4 = vsel %vm493_vm6, %v1763_v43, %v490_v11  ;;  %1766 = vtanh.f32 %v461_v2  ;;  %v480_v56 = vsel %vm477_vm7, %v479_v62, %v475_v52  ;;  %v3382_v62 = vld [vmem:[#allocation41_spill] sm:$0xff] }
  0xf4   :  { %v499_v45 = vsel %vm496_vm8, %v498_v51, %v494_v4 }
  0xf5   :  { %v521_v41 = vmul.f32 %v499_v45, %v374_v0 }
  0xf8   :  { %v1765_v50 = vpop.eup %1764 }
  0xf9   :  { %v505_v17 = vadd.f32 1.0, %v1765_v50  ;;  %v1767_v55 = vpop.eup %1766 }
  0xfa   :  { %v522_v43 = vmul.f32 %v1767_v55, %v480_v56  ;;  %v3383_v56 = vld [vmem:[#allocation48_spill] sm:$0xff] }
  0xfb   :  { %1768 = vrcp.f32 %v505_v17  ;;  %v517_v10 = vand.u32 2147483648, %v505_v17  ;;  %v515_v11 = vand.u32 2147483647, %v505_v17  ;;  %vm511_vm10 = vweird.f32 %v505_v17 }
  0xfc   :  { %v2616_v53 = vadd.f32 %v522_v43, %v521_v41 }
  0xfd   :  { %v518_v49 = vor.u32 1.1754944e-38, %v517_v10  ;;  %vm516_vm12 = vcmp.eq.f32.partialorder %v515_v11, 8.507059e+37 }
  0xfe   :  { %1770 = vtanh.f32 %v2616_v53 }
 0x101   :  { %v1769_v1 = vpop.eup %1768 }
 0x102   :  { %v507_v30 = vmul.f32 %v1769_v1, %v505_v17  ;;  %vm512_vm9 = vweird.f32 %v1769_v1 }
 0x103   :  { %vm513_vm11 = vmor %vm511_vm10, %vm512_vm9 }
 0x104   :  { %v508_v2 = vsub.f32 1.0, %v507_v30  ;;  %v1771_v33 = vpop.eup %1770 }
 0x106   :  { %v509_v42 = vmul.f32 %v1769_v1, %v508_v2 }
 0x108   :  { %v510_v59 = vadd.f32 %v1769_v1, %v509_v42 }
 0x10a   :  { %v514_v58 = vsel %vm513_vm11, %v1769_v1, %v510_v59 }
 0x10b   :  { %v519_v31 = vsel %vm516_vm12, %v518_v49, %v514_v58  ;;  %v3384_v49 = vld [vmem:[#allocation40_spill] sm:$0xff] }
 0x10c   :  { %v2619_v4 = vmul.f32 %v1771_v33, %v519_v31 }
 0x10e   :  { %3355 = vst [vmem:[#allocation63_spill] sm:$0xff] %v2619_v4  ;;  %547 = vmatmul.f32.vlgmr.msrb.gmra.mxu0 %v2619_v4  ;;  %567 = vmatmul.f32.vlgmr.msrb.gmra.mxu1 %v2619_v4 }
 0x10f   :  { %587 = vmatmul.f32.vlgmr.msrb.gmra.mxu2 %v2619_v4  ;;  %607 = vmatmul.f32.vlgmr.msrb.gmra.mxu3 %v2619_v4 }
 0x110   :  { %835 = vmatpush.msrb.mxu0 %v2122_v9  ;;  %855 = vmatpush.msrb.mxu1 %v2136_v13  ;;  %v3356_v9 = vld [vmem:[#allocation14_spill] sm:$0xff]  ;;  %v3358_v13 = vld [vmem:[#allocation32_spill] sm:$0xff] }
 0x111   :  { %875 = vmatpush.msrb.mxu2 %v2301_v54  ;;  %895 = vmatpush.msrb.mxu3 %v2143_v16  ;;  %v3361_v16 = vld [vmem:[#allocation21_spill] sm:$0xff] }
 0x112   :  { %836 = vmatpush.msrb.mxu0 %v2134_v12  ;;  %856 = vmatpush.msrb.mxu1 %v2141_v15  ;;  %v3357_v12 = vld [vmem:[#allocation18_spill] sm:$0xff]  ;;  %v3360_v15 = vld [vmem:[#allocation15_spill] sm:$0xff] }
 0x113   :  { %876 = vmatpush.msrb.mxu2 %v2312_v57  ;;  %896 = vmatpush.msrb.mxu3 %v2158_v19  ;;  %v3362_v19 = vld [vmem:[#allocation33_spill] sm:$0xff] }
 0x114   :  { %837 = vmatpush.msrb.mxu0 %v2139_v14  ;;  %857 = vmatpush.msrb.mxu1 %v2166_v21  ;;  %v3359_v14 = vld [vmem:[#allocation22_spill] sm:$0xff]  ;;  %v3364_v21 = vld [vmem:[#allocation16_spill] sm:$0xff] }
 0x115   :  { %877 = vmatpush.msrb.mxu2 %v2321_v60  ;;  %897 = vmatpush.msrb.mxu3 %v2171_v22  ;;  %v3365_v22 = vld [vmem:[#allocation23_spill] sm:$0xff] }
 0x116   :  { %838 = vmatpush.msrb.mxu0 %v2163_v20  ;;  %858 = vmatpush.msrb.mxu1 %v2179_v24  ;;  %v3363_v20 = vld [vmem:[#allocation24_spill] sm:$0xff] }
 0x117   :  { %878 = vmatpush.msrb.mxu2 %v2331_v61  ;;  %898 = vmatpush.msrb.mxu3 %v2183_v25  ;;  %v3367_v24 = vld [vmem:[#allocation28_spill] sm:$0xff]  ;;  %v3368_v25 = vld [vmem:[#allocation17_spill] sm:$0xff] }
 0x118   :  { %839 = vmatpush.msrb.mxu0 %v2177_v23  ;;  %859 = vmatpush.msrb.mxu1 %v2188_v27  ;;  %v3366_v23 = vld [vmem:[#allocation34_spill] sm:$0xff]  ;;  %v3370_v27 = vld [vmem:[#allocation35_spill] sm:$0xff] }
 0x119   :  { %879 = vmatpush.msrb.mxu2 %v2342_v63  ;;  %899 = vmatpush.msrb.mxu3 %v2193_v28  ;;  %v3371_v28 = vld [vmem:[#allocation29_spill] sm:$0xff] }
 0x11a   :  { %840 = vmatpush.msrb.mxu0 %v2185_v26  ;;  %860 = vmatpush.msrb.mxu1 %v3323_v5  ;;  %v3369_v26 = vld [vmem:[#allocation25_spill] sm:$0xff] }
 0x11b   :  { %880 = vmatpush.msrb.mxu2 %v2352_v3  ;;  %900 = vmatpush.msrb.mxu3 %v2220_v34  ;;  %v3374_v34 = vld [vmem:[#allocation36_spill] sm:$0xff] }
 0x11c   :  { %841 = vmatpush.msrb.mxu0 %v2195_v29  ;;  %861 = vmatpush.msrb.mxu1 %v2228_v36  ;;  %v3372_v29 = vld [vmem:[#allocation19_spill] sm:$0xff]  ;;  %v3376_v36 = vld [vmem:[#allocation20_spill] sm:$0xff] }
 0x11d   :  { %881 = vmatpush.msrb.mxu2 %v2358_v6  ;;  %901 = vmatpush.msrb.mxu3 %v2232_v37  ;;  %v3377_v37 = vld [vmem:[#allocation27_spill] sm:$0xff] }
 0x11e   :  { %842 = vmatpush.msrb.mxu0 %v2211_v32  ;;  %862 = vmatpush.msrb.mxu1 %v2237_v39  ;;  %v3373_v32 = vld [vmem:[#allocation26_spill] sm:$0xff]  ;;  %v3379_v39 = vld [vmem:[#allocation31_spill] sm:$0xff] }
 0x11f   :  { %882 = vmatpush.msrb.mxu2 %v2364_v7  ;;  %902 = vmatpush.msrb.mxu3 %v2242_v40  ;;  %v133_v40 = vpop.f32.mrf.mxu0 }
 0x120   :  { %843 = vmatpush.msrb.mxu0 %v2226_v35  ;;  %863 = vmatpush.msrb.mxu1 %v2258_v44  ;;  %v3375_v35 = vld [vmem:[#allocation30_spill] sm:$0xff] }
 0x121   :  { %883 = vmatpush.msrb.mxu2 %v2376_v8  ;;  %903 = vmatpush.msrb.mxu3 %v2273_v47  ;;  %v3381_v47 = vld [vmem:[#allocation59_spill] sm:$0xff] }
 0x122   :  { %844 = vmatpush.msrb.mxu0 %v2234_v38  ;;  %864 = vmatpush.msrb.mxu1 %v2271_v46  ;;  %v3378_v38 = vld [vmem:[#allocation37_spill] sm:$0xff] }
 0x123   :  { %884 = vmatpush.msrb.mxu2 %v2384_v18  ;;  %904 = vmatpush.msrb.mxu3 %v2277_v48  ;;  %v134_v48 = vadd.f32 %v133_v40, %v3381_v47 }
 0x124   :  { %845 = vmatpush.msrb.mxu0 %v3356_v9  ;;  %865 = vmatpush.msrb.mxu1 %v3357_v12 }
 0x125   :  { %885 = vmatpush.msrb.mxu2 %v3358_v13  ;;  %905 = vmatpush.msrb.mxu3 %v3359_v14 }
 0x126   :  { %846 = vmatpush.msrb.mxu0 %v3360_v15  ;;  %866 = vmatpush.msrb.mxu1 %v3361_v16 }
 0x127   :  { %886 = vmatpush.msrb.mxu2 %v3362_v19  ;;  %906 = vmatpush.msrb.mxu3 %v3363_v20  ;;  %v2689_v44 = vpop.f32.mrf.mxu0 }
 0x128   :  { %847 = vmatpush.msrb.mxu0 %v3364_v21  ;;  %867 = vmatpush.msrb.mxu1 %v3365_v22 }
 0x129   :  { %887 = vmatpush.msrb.mxu2 %v3366_v23  ;;  %907 = vmatpush.msrb.mxu3 %v3367_v24 }
 0x12a   :  { %848 = vmatpush.msrb.mxu0 %v3368_v25  ;;  %868 = vmatpush.msrb.mxu1 %v3369_v26 }
 0x12b   :  { %888 = vmatpush.msrb.mxu2 %v3370_v27  ;;  %908 = vmatpush.msrb.mxu3 %v3371_v28 }
 0x12c   :  { %849 = vmatpush.msrb.mxu0 %v3372_v29  ;;  %869 = vmatpush.msrb.mxu1 %v3373_v32 }
 0x12d   :  { %889 = vmatpush.msrb.mxu2 %v3374_v34  ;;  %909 = vmatpush.msrb.mxu3 %v3375_v35 }
 0x12e   :  { %850 = vmatpush.msrb.mxu0 %v3376_v36  ;;  %870 = vmatpush.msrb.mxu1 %v3377_v37 }
 0x12f   :  { %890 = vmatpush.msrb.mxu2 %v3378_v38  ;;  %910 = vmatpush.msrb.mxu3 %v3379_v39  ;;  %v2691_v46 = vpop.f32.mrf.mxu0 }
 0x130   :  { %3380 = vst [vmem:[#allocation14_spill] sm:$0xff] %v2691_v46 }
 0x18b   :  { %v548_v5 = vpop.f32.mrf.mxu0  ;;  %v568_v50 = vpop.f32.mrf.mxu1 }
 0x18c   :  { %v611_v51 = vadd.f32 %v548_v5, %v134_v48  ;;  %v612_v52 = vadd.f32 %v568_v50, %v3382_v62 }
 0x18e   :  { %v1723_v17 = vmul.f32 -1.442695, %v611_v51  ;;  %v1724_v0 = vmul.f32 -1.442695, %v612_v52 }
 0x190   :  { %1772 = vpow2.f32 %v1723_v17 }
 0x191   :  { %1774 = vpow2.f32 %v1724_v0 }
 0x192   :  { %v608_v45 = vpop.f32.mrf.mxu3  ;;  %v588_v10 = vpop.f32.mrf.mxu2 }
 0x193   :  { %v614_v41 = vadd.f32 %v608_v45, %v3383_v56  ;;  %v613_v58 = vadd.f32 %v588_v10, %v3384_v49  ;;  %v2717_v49 = vld [vmem:[#allocation4 + $0x1c0] sm:$0xff] }
 0x195   :  { %v1725_v55 = vmul.f32 -1.442695, %v614_v41 }
 0x196   :  { %v1773_v43 = vpop.eup %1772 }
 0x197   :  { %v1775_v1 = vpop.eup %1774  ;;  %v618_v30 = vadd.f32 1.0, %v1773_v43  ;;  %1776 = vpow2.f32 %v1725_v55 }
 0x198   :  { %v637_v2 = vadd.f32 1.0, %v1775_v1 }
 0x199   :  { %1778 = vrcp.f32 %v618_v30  ;;  %v630_v15 = vand.u32 2147483648, %v618_v30  ;;  %v628_v21 = vand.u32 2147483647, %v618_v30  ;;  %vm624_vm15 = vweird.f32 %v618_v30 }
 0x19a   :  { %1780 = vrcp.f32 %v637_v2  ;;  %v649_v16 = vand.u32 2147483648, %v637_v2  ;;  %v647_v25 = vand.u32 2147483647, %v637_v2  ;;  %vm643_vm0 = vweird.f32 %v637_v2 }
 0x19b   :  { %v631_v32 = vor.u32 1.1754944e-38, %v630_v15  ;;  %vm629_vm3 = vcmp.eq.f32.partialorder %v628_v21, 8.507059e+37  ;;  %v2747_v15 = vld [vmem:[#allocation4 + $0x160] sm:$0xff]  ;;  %v2764_v21 = vld [vmem:[#allocation4 + $0x158] sm:$0xff] }
 0x19c   :  { %v650_v40 = vor.u32 1.1754944e-38, %v649_v16  ;;  %vm648_vm4 = vcmp.eq.f32.partialorder %v647_v25, 8.507059e+37  ;;  %v2754_v16 = vld [vmem:[#allocation4 + $0x178] sm:$0xff] }
 0x19d   :  { %v1777_v42 = vpop.eup %1776  ;;  %v2774_v25 = vld [vmem:[#allocation4 + $0x138] sm:$0xff] }
 0x19e   :  { %v657_v11 = vadd.f32 1.0, %v1777_v42 }
 0x19f   :  { %v1779_v59 = vpop.eup %1778 }
 0x1a0   :  { %v1781_v33 = vpop.eup %1780  ;;  %v620_v31 = vmul.f32 %v1779_v59, %v618_v30  ;;  %1782 = vrcp.f32 %v657_v11  ;;  %vm625_vm13 = vweird.f32 %v1779_v59  ;;  %v669_v55 = vand.u32 2147483648, %v657_v11 }
 0x1a1   :  { %v639_v9 = vmul.f32 %v1781_v33, %v637_v2  ;;  %1784 = vtanh.f32 %v613_v58  ;;  %vm644_vm14 = vweird.f32 %v1781_v33  ;;  %vm626_vm1 = vmor %vm624_vm15, %vm625_vm13  ;;  %vm663_vm6 = vweird.f32 %v657_v11  ;;  %v2720_v58 = vld [vmem:[#allocation4 + $0x1c8] sm:$0xff] }
 0x1a2   :  { %v621_v12 = vsub.f32 1.0, %v620_v31  ;;  %vm645_vm2 = vmor %vm643_vm0, %vm644_vm14  ;;  %v667_v43 = vand.u32 2147483647, %v657_v11  ;;  %v670_v30 = vor.u32 1.1754944e-38, %v669_v55  ;;  %v2727_v31 = vld [vmem:[#allocation4 + $0x1a0] sm:$0xff] }
 0x1a3   :  { %v640_v14 = vsub.f32 1.0, %v639_v9  ;;  %v2734_v9 = vld [vmem:[#allocation4 + $0x1b8] sm:$0xff] }
 0x1a4   :  { %v622_v20 = vmul.f32 %v1779_v59, %v621_v12  ;;  %vm668_vm8 = vcmp.eq.f32.partialorder %v667_v43, 8.507059e+37  ;;  %v2737_v12 = vld [vmem:[#allocation4 + $0x180] sm:$0xff] }
 0x1a5   :  { %v641_v22 = vmul.f32 %v1781_v33, %v640_v14  ;;  %v2744_v14 = vld [vmem:[#allocation4 + $0x198] sm:$0xff] }
 0x1a6   :  { %v1783_v26 = vpop.eup %1782  ;;  %v623_v29 = vadd.f32 %v1779_v59, %v622_v20  ;;  %v2757_v20 = vld [vmem:[#allocation4 + $0x140] sm:$0xff] }
 0x1a7   :  { %v642_v36 = vadd.f32 %v1781_v33, %v641_v22  ;;  %v659_v37 = vmul.f32 %v1783_v26, %v657_v11  ;;  %v1785_v5 = vpop.eup %1784  ;;  %vm664_vm5 = vweird.f32 %v1783_v26  ;;  %v2710_v11 = vld [vmem:[#allocation4 + $0x1e8] sm:$0xff]  ;;  %v2767_v22 = vld [vmem:[#allocation4 + $0x120] sm:$0xff] }
 0x1a8   :  { %v627_v48 = vsel %vm626_vm1, %v1779_v59, %v623_v29  ;;  %vm665_vm7 = vmor %vm663_vm6, %vm664_vm5  ;;  %v2714_v59 = vld [vmem:[#allocation4 + $0x1f8] sm:$0xff] }
 0x1a9   :  { %v632_v50 = vsel %vm629_vm3, %v631_v32, %v627_v48  ;;  %v646_v51 = vsel %vm645_vm2, %v1781_v33, %v642_v36  ;;  %v660_v62 = vsub.f32 1.0, %v659_v37  ;;  %v2724_v33 = vld [vmem:[#allocation4 + $0x1d8] sm:$0xff]  ;;  %v2787_v32 = vld [vmem:[#allocation4 + $0xe0] sm:$0xff] }
 0x1aa   :  { %v651_v52 = vsel %vm648_vm4, %v650_v40, %v646_v51  ;;  %v674_v17 = vmul.f32 %v1785_v5, %v632_v50  ;;  %v2784_v29 = vld [vmem:[#allocation4 + $0x118] sm:$0xff]  ;;  %v2797_v37 = vld [vmem:[#allocation4 + $0xc0] sm:$0xff] }
 0x1ab   :  { %v673_v0 = vmul.f32 %v651_v52, %v2616_v53  ;;  %v661_v45 = vmul.f32 %v1783_v26, %v660_v62  ;;  %v2707_v53 = vld [vmem:[#allocation4 + $0x1e0] sm:$0xff]  ;;  %v2794_v36 = vld [vmem:[#allocation4 + $0xf8] sm:$0xff] }
 0x1ac   :  { %v2804_v40 = vld [vmem:[#allocation4 + $0xd8] sm:$0xff]  ;;  %v2807_v48 = vld [vmem:[#allocation4 + $0xa0] sm:$0xff] }
 0x1ad   :  { %v2698_v56 = vadd.f32 %v674_v17, %v673_v0  ;;  %v662_v41 = vadd.f32 %v1783_v26, %v661_v45  ;;  %3386 = vst [vmem:[#allocation32_spill] sm:$0xff] %v2804_v40  ;;  %v2814_v5 = vld [vmem:[#allocation4 + $0xb8] sm:$0xff]  ;;  %v2817_v50 = vld [vmem:[#allocation4 + $0x80] sm:$0xff]  ;;  %v2846_v0 = vld [vmem:[#allocation4 + $0x28] sm:$0xff] }
 0x1ae   :  { %3387 = vst [vmem:[#allocation22_spill] sm:$0xff] %v2807_v48  ;;  %v2824_v51 = vld [vmem:[#allocation4 + $0x98] sm:$0xff]  ;;  %v2827_v62 = vld [vmem:[#allocation4 + $0x60] sm:$0xff] }
 0x1af   :  { %1786 = vtanh.f32 %v2698_v56  ;;  %v666_v1 = vsel %vm665_vm7, %v1783_v26, %v662_v41  ;;  %v2777_v26 = vld [vmem:[#allocation4 + $0x100] sm:$0xff]  ;;  %3389 = vst [vmem:[#allocation21_spill] sm:$0xff] %v2814_v5  ;;  %v3401_v41 = vld [vmem:[#allocation44_spill] sm:$0xff] }
 0x1b0   :  { %v671_v10 = vsel %vm668_vm8, %v670_v30, %v666_v1  ;;  %3390 = vst [vmem:[#allocation33_spill] sm:$0xff] %v2817_v50  ;;  %v2835_v52 = vld [vmem:[#allocation4 + $0x40] sm:$0xff]  ;;  %v3402_v30 = vld [vmem:[#allocation51_spill] sm:$0xff] }
 0x1b1   :  { %3392 = vst [vmem:[#allocation16_spill] sm:$0xff] %v2824_v51  ;;  %v2843_v17 = vld [vmem:[#allocation4 + $0x20] sm:$0xff] }
 0x1b2   :  { %3393 = vst [vmem:[#allocation23_spill] sm:$0xff] %v2827_v62 }
 0x1b3   :  { %3395 = vst [vmem:[#allocation28_spill] sm:$0xff] %v2835_v52 }
 0x1b4   :  { %3397 = vst [vmem:[#allocation25_spill] sm:$0xff] %v2843_v17 }
 0x1b5   :  { %v1787_v2 = vpop.eup %1786  ;;  %3398 = vst [vmem:[#allocation35_spill] sm:$0xff] %v2846_v0 }
 0x1b6   :  { %v2701_v42 = vmul.f32 %v1787_v2, %v671_v10 }
 0x1b8   :  { %3385 = vst [vmem:[#allocation18_spill] sm:$0xff] %v2701_v42  ;;  %699 = vmatmul.f32.vlgmr.msra.gmra.mxu0 %v2701_v42  ;;  %719 = vmatmul.f32.vlgmr.msra.gmra.mxu1 %v2701_v42 }
 0x1b9   :  { %739 = vmatmul.f32.vlgmr.msra.gmra.mxu2 %v2701_v42  ;;  %759 = vmatmul.f32.vlgmr.msra.gmra.mxu3 %v2701_v42 }
 0x1ba   :  { %987 = vmatpush.msra.mxu0 %v2707_v53  ;;  %1007 = vmatpush.msra.mxu1 %v2710_v11 }
 0x1bb   :  { %1027 = vmatpush.msra.mxu2 %v2301_v54  ;;  %1047 = vmatpush.msra.mxu3 %v2714_v59  ;;  %v2730_v54 = vld [vmem:[#allocation4 + $0x1a8] sm:$0xff] }
 0x1bc   :  { %988 = vmatpush.msra.mxu0 %v2717_v49  ;;  %1008 = vmatpush.msra.mxu1 %v2720_v58 }
 0x1bd   :  { %1028 = vmatpush.msra.mxu2 %v2312_v57  ;;  %1048 = vmatpush.msra.mxu3 %v2724_v33  ;;  %v2740_v57 = vld [vmem:[#allocation4 + $0x188] sm:$0xff] }
 0x1be   :  { %989 = vmatpush.msra.mxu0 %v2727_v31  ;;  %1009 = vmatpush.msra.mxu1 %v2730_v54 }
 0x1bf   :  { %1029 = vmatpush.msra.mxu2 %v2321_v60  ;;  %1049 = vmatpush.msra.mxu3 %v2734_v9  ;;  %v2750_v60 = vld [vmem:[#allocation4 + $0x168] sm:$0xff] }
 0x1c0   :  { %990 = vmatpush.msra.mxu0 %v2737_v12  ;;  %1010 = vmatpush.msra.mxu1 %v2740_v57 }
 0x1c1   :  { %1030 = vmatpush.msra.mxu2 %v2331_v61  ;;  %1050 = vmatpush.msra.mxu3 %v2744_v14  ;;  %v2760_v61 = vld [vmem:[#allocation4 + $0x148] sm:$0xff] }
 0x1c2   :  { %991 = vmatpush.msra.mxu0 %v2747_v15  ;;  %1011 = vmatpush.msra.mxu1 %v2750_v60 }
 0x1c3   :  { %1031 = vmatpush.msra.mxu2 %v2342_v63  ;;  %1051 = vmatpush.msra.mxu3 %v2754_v16  ;;  %v2770_v63 = vld [vmem:[#allocation4 + $0x128] sm:$0xff] }
 0x1c4   :  { %992 = vmatpush.msra.mxu0 %v2757_v20  ;;  %1012 = vmatpush.msra.mxu1 %v2760_v61 }
 0x1c5   :  { %1032 = vmatpush.msra.mxu2 %v2352_v3  ;;  %1052 = vmatpush.msra.mxu3 %v2764_v21  ;;  %v2780_v3 = vld [vmem:[#allocation4 + $0x108] sm:$0xff] }
 0x1c6   :  { %993 = vmatpush.msra.mxu0 %v2767_v22  ;;  %1013 = vmatpush.msra.mxu1 %v2770_v63 }
 0x1c7   :  { %1033 = vmatpush.msra.mxu2 %v2358_v6  ;;  %1053 = vmatpush.msra.mxu3 %v2774_v25  ;;  %v2790_v6 = vld [vmem:[#allocation4 + $0xe8] sm:$0xff] }
 0x1c8   :  { %994 = vmatpush.msra.mxu0 %v2777_v26  ;;  %1014 = vmatpush.msra.mxu1 %v2780_v3 }
 0x1c9   :  { %1034 = vmatpush.msra.mxu2 %v2364_v7  ;;  %1054 = vmatpush.msra.mxu3 %v2784_v29  ;;  %v2800_v7 = vld [vmem:[#allocation4 + $0xc8] sm:$0xff] }
 0x1ca   :  { %995 = vmatpush.msra.mxu0 %v2787_v32  ;;  %1015 = vmatpush.msra.mxu1 %v2790_v6 }
 0x1cb   :  { %1035 = vmatpush.msra.mxu2 %v2376_v8  ;;  %1055 = vmatpush.msra.mxu3 %v2794_v36  ;;  %v2810_v8 = vld [vmem:[#allocation4 + $0xa8] sm:$0xff] }
 0x1cc   :  { %996 = vmatpush.msra.mxu0 %v2797_v37  ;;  %1016 = vmatpush.msra.mxu1 %v2800_v7  ;;  %3388 = vst [vmem:[#allocation15_spill] sm:$0xff] %v2810_v8 }
 0x1cd   :  { %1036 = vmatpush.msra.mxu2 %v2384_v18  ;;  %1056 = vmatpush.msra.mxu3 %v2804_v40  ;;  %v2820_v18 = vld [vmem:[#allocation4 + $0x88] sm:$0xff] }
 0x1ce   :  { %997 = vmatpush.msra.mxu0 %v2807_v48  ;;  %1017 = vmatpush.msra.mxu1 %v2810_v8  ;;  %3391 = vst [vmem:[#allocation24_spill] sm:$0xff] %v2820_v18 }
 0x1cf   :  { %1037 = vmatpush.msra.mxu2 %v3358_v13  ;;  %1057 = vmatpush.msra.mxu3 %v2814_v5  ;;  %v2830_v13 = vld [vmem:[#allocation4 + $0x68] sm:$0xff] }
 0x1d0   :  { %998 = vmatpush.msra.mxu0 %v2817_v50  ;;  %1018 = vmatpush.msra.mxu1 %v2820_v18  ;;  %3394 = vst [vmem:[#allocation34_spill] sm:$0xff] %v2830_v13 }
 0x1d1   :  { %1038 = vmatpush.msra.mxu2 %v3362_v19  ;;  %1058 = vmatpush.msra.mxu3 %v2824_v51  ;;  %v2838_v19 = vld [vmem:[#allocation4 + $0x48] sm:$0xff] }
 0x1d2   :  { %999 = vmatpush.msra.mxu0 %v2827_v62  ;;  %1019 = vmatpush.msra.mxu1 %v2830_v13  ;;  %3396 = vst [vmem:[#allocation17_spill] sm:$0xff] %v2838_v19 }
 0x1d3   :  { %1039 = vmatpush.msra.mxu2 %v3366_v23  ;;  %1059 = vmatpush.msra.mxu3 %v3367_v24  ;;  %v2851_v23 = vld [vmem:[#allocation4] sm:$0xff]  ;;  %v2854_v24 = vld [vmem:[#allocation4 + $0x8] sm:$0xff] }
 0x1d4   :  { %1000 = vmatpush.msra.mxu0 %v2835_v52  ;;  %1020 = vmatpush.msra.mxu1 %v2838_v19  ;;  %3399 = vst [vmem:[#allocation29_spill] sm:$0xff] %v2851_v23 }
 0x1d5   :  { %1040 = vmatpush.msra.mxu2 %v3370_v27  ;;  %1060 = vmatpush.msra.mxu3 %v3371_v28  ;;  %3400 = vst [vmem:[#allocation19_spill] sm:$0xff] %v2854_v24  ;;  %v137_v27 = vadd.f32 %v2689_v44, %v3381_v47 }
 0x1d6   :  { %1001 = vmatpush.msra.mxu0 %v2843_v17  ;;  %1021 = vmatpush.msra.mxu1 %v2846_v0 }
 0x1d7   :  { %1041 = vmatpush.msra.mxu2 %v3374_v34  ;;  %1061 = vmatpush.msra.mxu3 %v3375_v35 }
 0x1d8   :  { %1002 = vmatpush.msra.mxu0 %v2851_v23  ;;  %1022 = vmatpush.msra.mxu1 %v2854_v24 }
 0x1d9   :  { %1042 = vmatpush.msra.mxu2 %v3378_v38  ;;  %1062 = vmatpush.msra.mxu3 %v3379_v39 }
 0x235   :  { %v700_v28 = vpop.f32.mrf.mxu0  ;;  %v720_v45 = vpop.f32.mrf.mxu1 }
 0x236   :  { %v763_v34 = vadd.f32 %v700_v28, %v137_v27  ;;  %v764_v35 = vadd.f32 %v720_v45, %v3401_v41  ;;  %v3403_v45 = vld [vmem:[#allocation43_spill] sm:$0xff] }
 0x238   :  { %v1726_v55 = vmul.f32 -1.442695, %v763_v34  ;;  %v1727_v43 = vmul.f32 -1.442695, %v764_v35 }
 0x23a   :  { %1788 = vpow2.f32 %v1726_v55 }
 0x23b   :  { %1790 = vpow2.f32 %v1727_v43 }
 0x23c   :  { %v760_v1 = vpop.f32.mrf.mxu3  ;;  %v740_v44 = vpop.f32.mrf.mxu2 }
 0x23d   :  { %v766_v2 = vadd.f32 %v760_v1, %v3402_v30  ;;  %v765_v34 = vadd.f32 %v740_v44, %v3403_v45 }
 0x23f   :  { %v1728_v10 = vmul.f32 -1.442695, %v766_v2 }
 0x240   :  { %v1789_v42 = vpop.eup %1788 }
 0x241   :  { %v1791_v38 = vpop.eup %1790  ;;  %v770_v4 = vadd.f32 1.0, %v1789_v42  ;;  %1792 = vpow2.f32 %v1728_v10 }
 0x242   :  { %v789_v39 = vadd.f32 1.0, %v1791_v38 }
 0x243   :  { %1794 = vrcp.f32 %v770_v4  ;;  %v782_v30 = vand.u32 2147483648, %v770_v4  ;;  %v780_v10 = vand.u32 2147483647, %v770_v4  ;;  %vm776_vm11 = vweird.f32 %v770_v4 }
 0x244   :  { %1796 = vrcp.f32 %v789_v39  ;;  %v801_v2 = vand.u32 2147483648, %v789_v39  ;;  %v799_v47 = vand.u32 2147483647, %v789_v39  ;;  %vm795_vm12 = vweird.f32 %v789_v39 }
 0x245   :  { %v783_v44 = vor.u32 1.1754944e-38, %v782_v30  ;;  %vm781_vm15 = vcmp.eq.f32.partialorder %v780_v10, 8.507059e+37 }
 0x246   :  { %vm800_vm0 = vcmp.eq.f32.partialorder %v799_v47, 8.507059e+37 }
 0x247   :  { %v1793_v46 = vpop.eup %1792 }
 0x248   :  { %v809_v27 = vadd.f32 1.0, %v1793_v46 }
 0x249   :  { %v1795_v28 = vpop.eup %1794 }
 0x24a   :  { %v1797_v41 = vpop.eup %1796  ;;  %v772_v35 = vmul.f32 %v1795_v28, %v770_v4  ;;  %1798 = vrcp.f32 %v809_v27  ;;  %vm777_vm9 = vweird.f32 %v1795_v28  ;;  %v821_v30 = vand.u32 2147483648, %v809_v27 }
 0x24b   :  { %v791_v55 = vmul.f32 %v1797_v41, %v789_v39  ;;  %1800 = vtanh.f32 %v765_v34  ;;  %vm796_vm10 = vweird.f32 %v1797_v41  ;;  %vm778_vm13 = vmor %vm776_vm11, %vm777_vm9  ;;  %vm815_vm2 = vweird.f32 %v809_v27 }
 0x24c   :  { %v773_v43 = vsub.f32 1.0, %v772_v35  ;;  %vm797_vm14 = vmor %vm795_vm12, %vm796_vm10  ;;  %v802_v35 = vor.u32 1.1754944e-38, %v801_v2  ;;  %v822_v10 = vor.u32 1.1754944e-38, %v821_v30  ;;  %v3414_v30 = vld [vmem:[#allocation25_spill] sm:$0xff] }
 0x24d   :  { %v792_v1 = vsub.f32 1.0, %v791_v55 }
 0x24e   :  { %v774_v42 = vmul.f32 %v1795_v28, %v773_v43 }
 0x24f   :  { %v793_v38 = vmul.f32 %v1797_v41, %v792_v1 }
 0x250   :  { %v1799_v24 = vpop.eup %1798  ;;  %v775_v46 = vadd.f32 %v1795_v28, %v774_v42 }
 0x251   :  { %v794_v45 = vadd.f32 %v1797_v41, %v793_v38  ;;  %v811_v23 = vmul.f32 %v1799_v24, %v809_v27  ;;  %v1801_v34 = vpop.eup %1800  ;;  %vm816_vm1 = vweird.f32 %v1799_v24  ;;  %v2918_v38 = vld [vmem:[#allocation4 + $0x110] sm:$0xff] }
 0x252   :  { %v779_v55 = vsel %vm778_vm13, %v1795_v28, %v775_v46  ;;  %v819_v28 = vand.u32 2147483647, %v809_v27  ;;  %vm817_vm3 = vmor %vm815_vm2, %vm816_vm1  ;;  %v2912_v27 = vld [vmem:[#allocation4 + $0x130] sm:$0xff] }
 0x253   :  { %v784_v0 = vsel %vm781_vm15, %v783_v44, %v779_v55  ;;  %v798_v43 = vsel %vm797_vm14, %v1797_v41, %v794_v45  ;;  %v812_v17 = vsub.f32 1.0, %v811_v23  ;;  %v2924_v46 = vld [vmem:[#allocation4 + $0xf0] sm:$0xff] }
 0x254   :  { %v803_v1 = vsel %vm800_vm0, %v802_v35, %v798_v43  ;;  %v826_v19 = vmul.f32 %v1801_v34, %v784_v0  ;;  %vm820_vm4 = vcmp.eq.f32.partialorder %v819_v28, 8.507059e+37  ;;  %v2900_v0 = vld [vmem:[#allocation4 + $0x170] sm:$0xff]  ;;  %v2951_v34 = vld [vmem:[#allocation4 + $0x78] sm:$0xff] }
 0x255   :  { %v825_v52 = vmul.f32 %v803_v1, %v2698_v56  ;;  %v813_v42 = vmul.f32 %v1799_v24, %v812_v17  ;;  %v2876_v56 = vld [vmem:[#allocation4 + $0x1f0] sm:$0xff]  ;;  %3409 = vst [vmem:[#allocation37_spill] sm:$0xff] %v2951_v34  ;;  %v3410_v43 = vld [vmem:[#allocation28_spill] sm:$0xff]  ;;  %v3411_v1 = vld [vmem:[#allocation17_spill] sm:$0xff] }
 0x256   :  { %v2894_v17 = vld [vmem:[#allocation4 + $0x190] sm:$0xff] }
 0x257   :  { %v2865_v4 = vadd.f32 %v826_v19, %v825_v52  ;;  %v814_v39 = vadd.f32 %v1799_v24, %v813_v42  ;;  %v2882_v52 = vld [vmem:[#allocation4 + $0x1d0] sm:$0xff] }
 0x258   :  { %v2888_v19 = vld [vmem:[#allocation4 + $0x1b0] sm:$0xff] }
 0x259   :  { %1802 = vtanh.f32 %v2865_v4  ;;  %v818_v2 = vsel %vm817_vm3, %v1799_v24, %v814_v39  ;;  %v2906_v24 = vld [vmem:[#allocation4 + $0x150] sm:$0xff]  ;;  %v2959_v39 = vld [vmem:[#allocation4 + $0x58] sm:$0xff] }
 0x25a   :  { %v823_v23 = vsel %vm820_vm4, %v822_v10, %v818_v2  ;;  %v2930_v44 = vld [vmem:[#allocation4 + $0xd0] sm:$0xff]  ;;  %3413 = vst [vmem:[#allocation41_spill] sm:$0xff] %v2959_v39  ;;  %v2967_v10 = vld [vmem:[#allocation4 + $0x38] sm:$0xff] }
 0x25b   :  { %3405 = vst [vmem:[#allocation36_spill] sm:$0xff] %v2930_v44  ;;  %v2936_v45 = vld [vmem:[#allocation4 + $0xb0] sm:$0xff] }
 0x25c   :  { %3406 = vst [vmem:[#allocation30_spill] sm:$0xff] %v2936_v45  ;;  %v2942_v35 = vld [vmem:[#allocation4 + $0x90] sm:$0xff] }
 0x25d   :  { %3407 = vst [vmem:[#allocation20_spill] sm:$0xff] %v2942_v35  ;;  %v2948_v55 = vld [vmem:[#allocation4 + $0x70] sm:$0xff] }
 0x25e   :  { %3408 = vst [vmem:[#allocation27_spill] sm:$0xff] %v2948_v55  ;;  %v2956_v42 = vld [vmem:[#allocation4 + $0x50] sm:$0xff] }
 0x25f   :  { %v1803_v47 = vpop.eup %1802  ;;  %3412 = vst [vmem:[#allocation31_spill] sm:$0xff] %v2956_v42  ;;  %v3415_v28 = vld [vmem:[#allocation35_spill] sm:$0xff] }
 0x260   :  { %v2868_v41 = vmul.f32 %v1803_v47, %v823_v23  ;;  %v2964_v2 = vld [vmem:[#allocation4 + $0x30] sm:$0xff]  ;;  %3417 = vst [vmem:[#allocation40_spill] sm:$0xff] %v2967_v10  ;;  %v3418_v47 = vld [vmem:[#allocation29_spill] sm:$0xff] }
 0x261   :  { %3416 = vst [vmem:[#allocation48_spill] sm:$0xff] %v2964_v2  ;;  %v3419_v23 = vld [vmem:[#allocation19_spill] sm:$0xff] }
 0x262   :  { %3404 = vst [vmem:[#allocation26_spill] sm:$0xff] %v2868_v41  ;;  %851 = vmatmul.f32.vlgmr.msrb.gmra.mxu0 %v2868_v41  ;;  %871 = vmatmul.f32.vlgmr.msrb.gmra.mxu1 %v2868_v41 }
 0x263   :  { %891 = vmatmul.f32.vlgmr.msrb.gmra.mxu2 %v2868_v41  ;;  %911 = vmatmul.f32.vlgmr.msrb.gmra.mxu3 %v2868_v41  ;;  %v2972_v41 = vld [vmem:[#allocation4 + $0x10] sm:$0xff] }
 0x264   :  { %1139 = vmatpush.msrb.mxu0 %v2707_v53  ;;  %1159 = vmatpush.msrb.mxu1 %v2710_v11  ;;  %3420 = vst [vmem:[#allocation44_spill] sm:$0xff] %v2972_v41 }
 0x265   :  { %1179 = vmatpush.msrb.mxu2 %v2876_v56  ;;  %1199 = vmatpush.msrb.mxu3 %v2714_v59 }
 0x266   :  { %1140 = vmatpush.msrb.mxu0 %v2717_v49  ;;  %1160 = vmatpush.msrb.mxu1 %v2720_v58 }
 0x267   :  { %1180 = vmatpush.msrb.mxu2 %v2882_v52  ;;  %1200 = vmatpush.msrb.mxu3 %v2724_v33 }
 0x268   :  { %1141 = vmatpush.msrb.mxu0 %v2727_v31  ;;  %1161 = vmatpush.msrb.mxu1 %v2730_v54 }
 0x269   :  { %1181 = vmatpush.msrb.mxu2 %v2888_v19  ;;  %1201 = vmatpush.msrb.mxu3 %v2734_v9 }
 0x26a   :  { %1142 = vmatpush.msrb.mxu0 %v2737_v12  ;;  %1162 = vmatpush.msrb.mxu1 %v2740_v57 }
 0x26b   :  { %1182 = vmatpush.msrb.mxu2 %v2894_v17  ;;  %1202 = vmatpush.msrb.mxu3 %v2744_v14 }
 0x26c   :  { %1143 = vmatpush.msrb.mxu0 %v2747_v15  ;;  %1163 = vmatpush.msrb.mxu1 %v2750_v60 }
 0x26d   :  { %1183 = vmatpush.msrb.mxu2 %v2900_v0  ;;  %1203 = vmatpush.msrb.mxu3 %v2754_v16 }
 0x26e   :  { %1144 = vmatpush.msrb.mxu0 %v2757_v20  ;;  %1164 = vmatpush.msrb.mxu1 %v2760_v61 }
 0x26f   :  { %1184 = vmatpush.msrb.mxu2 %v2906_v24  ;;  %1204 = vmatpush.msrb.mxu3 %v2764_v21 }
 0x270   :  { %1145 = vmatpush.msrb.mxu0 %v2767_v22  ;;  %1165 = vmatpush.msrb.mxu1 %v2770_v63 }
 0x271   :  { %1185 = vmatpush.msrb.mxu2 %v2912_v27  ;;  %1205 = vmatpush.msrb.mxu3 %v2774_v25 }
 0x272   :  { %1146 = vmatpush.msrb.mxu0 %v2777_v26  ;;  %1166 = vmatpush.msrb.mxu1 %v2780_v3 }
 0x273   :  { %1186 = vmatpush.msrb.mxu2 %v2918_v38  ;;  %1206 = vmatpush.msrb.mxu3 %v2784_v29 }
 0x274   :  { %1147 = vmatpush.msrb.mxu0 %v2787_v32  ;;  %1167 = vmatpush.msrb.mxu1 %v2790_v6 }
 0x275   :  { %1187 = vmatpush.msrb.mxu2 %v2924_v46  ;;  %1207 = vmatpush.msrb.mxu3 %v2794_v36 }
 0x276   :  { %1148 = vmatpush.msrb.mxu0 %v2797_v37  ;;  %1168 = vmatpush.msrb.mxu1 %v2800_v7 }
 0x277   :  { %1188 = vmatpush.msrb.mxu2 %v2930_v44  ;;  %1208 = vmatpush.msrb.mxu3 %v2804_v40 }
 0x278   :  { %1149 = vmatpush.msrb.mxu0 %v2807_v48  ;;  %1169 = vmatpush.msrb.mxu1 %v2810_v8 }
 0x279   :  { %1189 = vmatpush.msrb.mxu2 %v2936_v45  ;;  %1209 = vmatpush.msrb.mxu3 %v2814_v5 }
 0x27a   :  { %1150 = vmatpush.msrb.mxu0 %v2817_v50  ;;  %1170 = vmatpush.msrb.mxu1 %v2820_v18 }
 0x27b   :  { %1190 = vmatpush.msrb.mxu2 %v2942_v35  ;;  %1210 = vmatpush.msrb.mxu3 %v2824_v51 }
 0x27c   :  { %1151 = vmatpush.msrb.mxu0 %v2827_v62  ;;  %1171 = vmatpush.msrb.mxu1 %v2830_v13  ;;  %v3425_v13 = vld [vmem:[#allocation54_spill] sm:$0xff] }
 0x27d   :  { %1191 = vmatpush.msrb.mxu2 %v2948_v55  ;;  %1211 = vmatpush.msrb.mxu3 %v2951_v34  ;;  %v3424_v34 = vld [vmem:[#allocation46_spill] sm:$0xff] }
 0x27e   :  { %1152 = vmatpush.msrb.mxu0 %v3410_v43  ;;  %1172 = vmatpush.msrb.mxu1 %v3411_v1 }
 0x27f   :  { %1192 = vmatpush.msrb.mxu2 %v2956_v42  ;;  %1212 = vmatpush.msrb.mxu3 %v2959_v39  ;;  %v2975_v39 = vld [vmem:[#allocation4 + $0x18] sm:$0xff] }
 0x280   :  { %1153 = vmatpush.msrb.mxu0 %v3414_v30  ;;  %1173 = vmatpush.msrb.mxu1 %v3415_v28  ;;  %3421 = vst [vmem:[#allocation51_spill] sm:$0xff] %v2975_v39  ;;  %v3422_v28 = vld [vmem:[#allocation59_spill] sm:$0xff]  ;;  %v3423_v30 = vld [vmem:[#allocation14_spill] sm:$0xff] }
 0x281   :  { %1193 = vmatpush.msrb.mxu2 %v2964_v2  ;;  %1213 = vmatpush.msrb.mxu3 %v2967_v10  ;;  %v140_v42 = vadd.f32 %v3423_v30, %v3422_v28 }
 0x282   :  { %1154 = vmatpush.msrb.mxu0 %v3418_v47  ;;  %1174 = vmatpush.msrb.mxu1 %v3419_v23 }
 0x283   :  { %1194 = vmatpush.msrb.mxu2 %v2972_v41  ;;  %1214 = vmatpush.msrb.mxu3 %v2975_v39 }
 0x2df   :  { %v852_v2 = vpop.f32.mrf.mxu0  ;;  %v872_v1 = vpop.f32.mrf.mxu1 }
 0x2e0   :  { %v915_v43 = vadd.f32 %v852_v2, %v140_v42  ;;  %v916_v10 = vadd.f32 %v872_v1, %v3424_v34  ;;  %v3426_v34 = vld [vmem:[#allocation45_spill] sm:$0xff] }
 0x2e2   :  { %v1729_v55 = vmul.f32 -1.442695, %v915_v43  ;;  %v1730_v47 = vmul.f32 -1.442695, %v916_v10 }
 0x2e4   :  { %1804 = vpow2.f32 %v1729_v55 }
 0x2e5   :  { %1806 = vpow2.f32 %v1730_v47 }
 0x2e6   :  { %v912_v23 = vpop.f32.mrf.mxu3  ;;  %v892_v30 = vpop.f32.mrf.mxu2 }
 0x2e7   :  { %v918_v62 = vadd.f32 %v912_v23, %v3425_v13  ;;  %v917_v43 = vadd.f32 %v892_v30, %v3426_v34 }
 0x2e9   :  { %v1731_v41 = vmul.f32 -1.442695, %v918_v62 }
 0x2ea   :  { %v1805_v51 = vpop.eup %1804 }
 0x2eb   :  { %v1807_v35 = vpop.eup %1806  ;;  %v922_v18 = vadd.f32 1.0, %v1805_v51  ;;  %1808 = vpow2.f32 %v1731_v41 }
 0x2ec   :  { %v941_v39 = vadd.f32 1.0, %v1807_v35 }
 0x2ed   :  { %1810 = vrcp.f32 %v922_v18  ;;  %v934_v62 = vand.u32 2147483648, %v922_v18  ;;  %v932_v41 = vand.u32 2147483647, %v922_v18  ;;  %vm928_vm7 = vweird.f32 %v922_v18 }
 0x2ee   :  { %1812 = vrcp.f32 %v941_v39  ;;  %v953_v23 = vand.u32 2147483648, %v941_v39  ;;  %v951_v50 = vand.u32 2147483647, %v941_v39  ;;  %vm947_vm8 = vweird.f32 %v941_v39 }
 0x2ef   :  { %v935_v30 = vor.u32 1.1754944e-38, %v934_v62  ;;  %vm933_vm11 = vcmp.eq.f32.partialorder %v932_v41, 8.507059e+37 }
 0x2f0   :  { %vm952_vm12 = vcmp.eq.f32.partialorder %v951_v50, 8.507059e+37 }
 0x2f1   :  { %v1809_v28 = vpop.eup %1808 }
 0x2f2   :  { %v961_v42 = vadd.f32 1.0, %v1809_v28 }
 0x2f3   :  { %v1811_v2 = vpop.eup %1810 }
 0x2f4   :  { %v1813_v1 = vpop.eup %1812  ;;  %v924_v55 = vmul.f32 %v1811_v2, %v922_v18  ;;  %1814 = vrcp.f32 %v961_v42  ;;  %vm929_vm5 = vweird.f32 %v1811_v2  ;;  %v973_v62 = vand.u32 2147483648, %v961_v42 }
 0x2f5   :  { %v943_v10 = vmul.f32 %v1813_v1, %v941_v39  ;;  %1816 = vtanh.f32 %v917_v43  ;;  %vm948_vm6 = vweird.f32 %v1813_v1  ;;  %vm930_vm9 = vmor %vm928_vm7, %vm929_vm5  ;;  %vm967_vm14 = vweird.f32 %v961_v42 }
 0x2f6   :  { %v925_v47 = vsub.f32 1.0, %v924_v55  ;;  %vm949_vm10 = vmor %vm947_vm8, %vm948_vm6  ;;  %v954_v55 = vor.u32 1.1754944e-38, %v953_v23  ;;  %v974_v41 = vor.u32 1.1754944e-38, %v973_v62  ;;  %v3446_v62 = vld [vmem:[#allocation25_spill] sm:$0xff] }
 0x2f7   :  { %v944_v13 = vsub.f32 1.0, %v943_v10 }
 0x2f8   :  { %v926_v51 = vmul.f32 %v1811_v2, %v925_v47 }
 0x2f9   :  { %v945_v35 = vmul.f32 %v1813_v1, %v944_v13 }
 0x2fa   :  { %v1815_v5 = vpop.eup %1814  ;;  %v927_v28 = vadd.f32 %v1811_v2, %v926_v51 }
 0x2fb   :  { %v946_v34 = vadd.f32 %v1813_v1, %v945_v35  ;;  %v963_v45 = vmul.f32 %v1815_v5, %v961_v42  ;;  %v1817_v43 = vpop.eup %1816  ;;  %vm968_vm13 = vweird.f32 %v1815_v5  ;;  %v3435_v35 = vld [vmem:[#allocation24_spill] sm:$0xff] }
 0x2fc   :  { %v931_v10 = vsel %vm930_vm9, %v1811_v2, %v927_v28  ;;  %v971_v2 = vand.u32 2147483647, %v961_v42  ;;  %vm969_vm15 = vmor %vm967_vm14, %vm968_vm13  ;;  %v3434_v42 = vld [vmem:[#allocation33_spill] sm:$0xff]  ;;  %v3436_v28 = vld [vmem:[#allocation20_spill] sm:$0xff] }
 0x2fd   :  { %v936_v8 = vsel %vm933_vm11, %v935_v30, %v931_v10  ;;  %v950_v47 = vsel %vm949_vm10, %v1813_v1, %v946_v34  ;;  %v964_v48 = vsub.f32 1.0, %v963_v45  ;;  %v3437_v30 = vld [vmem:[#allocation16_spill] sm:$0xff]  ;;  %v3438_v34 = vld [vmem:[#allocation23_spill] sm:$0xff] }
 0x2fe   :  { %v955_v13 = vsel %vm952_vm12, %v954_v55, %v950_v47  ;;  %v978_v40 = vmul.f32 %v1817_v43, %v936_v8  ;;  %vm972_vm0 = vcmp.eq.f32.partialorder %v971_v2, 8.507059e+37  ;;  %v3430_v8 = vld [vmem:[#allocation22_spill] sm:$0xff]  ;;  %v3440_v10 = vld [vmem:[#allocation27_spill] sm:$0xff]  ;;  %v3441_v43 = vld [vmem:[#allocation37_spill] sm:$0xff] }
 0x2ff   :  { %v977_v44 = vmul.f32 %v955_v13, %v2865_v4  ;;  %v965_v51 = vmul.f32 %v1815_v5, %v964_v48  ;;  %v3429_v48 = vld [vmem:[#allocation32_spill] sm:$0xff]  ;;  %v3432_v4 = vld [vmem:[#allocation30_spill] sm:$0xff]  ;;  %v3443_v13 = vld [vmem:[#allocation17_spill] sm:$0xff] }
 0x300   :  { %v3439_v55 = vld [vmem:[#allocation34_spill] sm:$0xff]  ;;  %v3442_v47 = vld [vmem:[#allocation28_spill] sm:$0xff]  ;;  %v3447_v2 = vld [vmem:[#allocation35_spill] sm:$0xff] }
 0x301   :  { %v2984_v18 = vadd.f32 %v978_v40, %v977_v44  ;;  %v966_v39 = vadd.f32 %v1815_v5, %v965_v51  ;;  %v3428_v40 = vld [vmem:[#allocation36_spill] sm:$0xff]  ;;  %v3433_v44 = vld [vmem:[#allocation21_spill] sm:$0xff]  ;;  %v3444_v51 = vld [vmem:[#allocation31_spill] sm:$0xff] }
 0x303   :  { %1818 = vtanh.f32 %v2984_v18  ;;  %v970_v23 = vsel %vm969_vm15, %v1815_v5, %v966_v39  ;;  %v3431_v5 = vld [vmem:[#allocation15_spill] sm:$0xff]  ;;  %v3445_v39 = vld [vmem:[#allocation41_spill] sm:$0xff] }
 0x304   :  { %v975_v45 = vsel %vm972_vm0, %v974_v41, %v970_v23  ;;  %v3448_v23 = vld [vmem:[#allocation48_spill] sm:$0xff] }
 0x305   :  { %v3449_v41 = vld [vmem:[#allocation40_spill] sm:$0xff] }
 0x309   :  { %v1819_v50 = vpop.eup %1818 }
 0x30a   :  { %v2987_v1 = vmul.f32 %v1819_v50, %v975_v45  ;;  %v3450_v50 = vld [vmem:[#allocation29_spill] sm:$0xff]  ;;  %v3451_v45 = vld [vmem:[#allocation19_spill] sm:$0xff] }
 0x30c   :  { %3427 = vst [vmem:[#allocation43_spill] sm:$0xff] %v2987_v1  ;;  %1003 = vmatmul.f32.vlgmr.msra.gmra.mxu0 %v2987_v1  ;;  %1023 = vmatmul.f32.vlgmr.msra.gmra.mxu1 %v2987_v1 }
 0x30d   :  { %1043 = vmatmul.f32.vlgmr.msra.gmra.mxu2 %v2987_v1  ;;  %1063 = vmatmul.f32.vlgmr.msra.gmra.mxu3 %v2987_v1  ;;  %v3452_v1 = vld [vmem:[#allocation44_spill] sm:$0xff] }
 0x30e   :  { %1291 = vmatpush.msra.mxu0 %v2707_v53  ;;  %1311 = vmatpush.msra.mxu1 %v2710_v11 }
 0x30f   :  { %1331 = vmatpush.msra.mxu2 %v2876_v56  ;;  %1351 = vmatpush.msra.mxu3 %v2714_v59 }
 0x310   :  { %1292 = vmatpush.msra.mxu0 %v2717_v49  ;;  %1312 = vmatpush.msra.mxu1 %v2720_v58 }
 0x311   :  { %1332 = vmatpush.msra.mxu2 %v2882_v52  ;;  %1352 = vmatpush.msra.mxu3 %v2724_v33 }
 0x312   :  { %1293 = vmatpush.msra.mxu0 %v2727_v31  ;;  %1313 = vmatpush.msra.mxu1 %v2730_v54 }
 0x313   :  { %1333 = vmatpush.msra.mxu2 %v2888_v19  ;;  %1353 = vmatpush.msra.mxu3 %v2734_v9 }
 0x314   :  { %1294 = vmatpush.msra.mxu0 %v2737_v12  ;;  %1314 = vmatpush.msra.mxu1 %v2740_v57 }
 0x315   :  { %1334 = vmatpush.msra.mxu2 %v2894_v17  ;;  %1354 = vmatpush.msra.mxu3 %v2744_v14 }
 0x316   :  { %1295 = vmatpush.msra.mxu0 %v2747_v15  ;;  %1315 = vmatpush.msra.mxu1 %v2750_v60 }
 0x317   :  { %1335 = vmatpush.msra.mxu2 %v2900_v0  ;;  %1355 = vmatpush.msra.mxu3 %v2754_v16 }
 0x318   :  { %1296 = vmatpush.msra.mxu0 %v2757_v20  ;;  %1316 = vmatpush.msra.mxu1 %v2760_v61 }
 0x319   :  { %1336 = vmatpush.msra.mxu2 %v2906_v24  ;;  %1356 = vmatpush.msra.mxu3 %v2764_v21 }
 0x31a   :  { %1297 = vmatpush.msra.mxu0 %v2767_v22  ;;  %1317 = vmatpush.msra.mxu1 %v2770_v63 }
 0x31b   :  { %1337 = vmatpush.msra.mxu2 %v2912_v27  ;;  %1357 = vmatpush.msra.mxu3 %v2774_v25 }
 0x31c   :  { %1298 = vmatpush.msra.mxu0 %v2777_v26  ;;  %1318 = vmatpush.msra.mxu1 %v2780_v3 }
 0x31d   :  { %1338 = vmatpush.msra.mxu2 %v2918_v38  ;;  %1358 = vmatpush.msra.mxu3 %v2784_v29 }
 0x31e   :  { %1299 = vmatpush.msra.mxu0 %v2787_v32  ;;  %1319 = vmatpush.msra.mxu1 %v2790_v6 }
 0x31f   :  { %1339 = vmatpush.msra.mxu2 %v2924_v46  ;;  %1359 = vmatpush.msra.mxu3 %v2794_v36 }
 0x320   :  { %1300 = vmatpush.msra.mxu0 %v2797_v37  ;;  %1320 = vmatpush.msra.mxu1 %v2800_v7 }
 0x321   :  { %1340 = vmatpush.msra.mxu2 %v3428_v40  ;;  %1360 = vmatpush.msra.mxu3 %v3429_v48 }
 0x322   :  { %1301 = vmatpush.msra.mxu0 %v3430_v8  ;;  %1321 = vmatpush.msra.mxu1 %v3431_v5 }
 0x323   :  { %1341 = vmatpush.msra.mxu2 %v3432_v4  ;;  %1361 = vmatpush.msra.mxu3 %v3433_v44 }
 0x324   :  { %1302 = vmatpush.msra.mxu0 %v3434_v42  ;;  %1322 = vmatpush.msra.mxu1 %v3435_v35 }
 0x325   :  { %1342 = vmatpush.msra.mxu2 %v3436_v28  ;;  %1362 = vmatpush.msra.mxu3 %v3437_v30 }
 0x326   :  { %1303 = vmatpush.msra.mxu0 %v3438_v34  ;;  %1323 = vmatpush.msra.mxu1 %v3439_v55  ;;  %v3456_v55 = vld [vmem:[#allocation49_spill] sm:$0xff] }
 0x327   :  { %1343 = vmatpush.msra.mxu2 %v3440_v10  ;;  %1363 = vmatpush.msra.mxu3 %v3441_v43 }
 0x328   :  { %1304 = vmatpush.msra.mxu0 %v3442_v47  ;;  %1324 = vmatpush.msra.mxu1 %v3443_v13  ;;  %v3453_v47 = vld [vmem:[#allocation51_spill] sm:$0xff] }
 0x329   :  { %1344 = vmatpush.msra.mxu2 %v3444_v51  ;;  %1364 = vmatpush.msra.mxu3 %v3445_v39  ;;  %v3454_v13 = vld [vmem:[#allocation59_spill] sm:$0xff]  ;;  %v3455_v51 = vld [vmem:[#allocation13_spill] sm:$0xff] }
 0x32a   :  { %1305 = vmatpush.msra.mxu0 %v3446_v62  ;;  %1325 = vmatpush.msra.mxu1 %v3447_v2  ;;  %v143_v43 = vadd.f32 %v3455_v51, %v3454_v13 }
 0x32b   :  { %1345 = vmatpush.msra.mxu2 %v3448_v23  ;;  %1365 = vmatpush.msra.mxu3 %v3449_v41 }
 0x32c   :  { %1306 = vmatpush.msra.mxu0 %v3450_v50  ;;  %1326 = vmatpush.msra.mxu1 %v3451_v45  ;;  %v3457_v50 = vld [vmem:[#allocation57_spill] sm:$0xff] }
 0x32d   :  { %1346 = vmatpush.msra.mxu2 %v3452_v1  ;;  %1366 = vmatpush.msra.mxu3 %v3453_v47 }
 0x389   :  { %v1004_v39 = vpop.f32.mrf.mxu0  ;;  %v1024_v10 = vpop.f32.mrf.mxu1 }
 0x38a   :  { %v1067_v62 = vadd.f32 %v1004_v39, %v143_v43  ;;  %v1068_v2 = vadd.f32 %v1024_v10, %v3456_v55  ;;  %v3458_v55 = vld [vmem:[#allocation47_spill] sm:$0xff] }
 0x38c   :  { %v1732_v34 = vmul.f32 -1.442695, %v1067_v62  ;;  %v1733_v23 = vmul.f32 -1.442695, %v1068_v2 }
 0x38e   :  { %1820 = vpow2.f32 %v1732_v34 }
 0x38f   :  { %1822 = vpow2.f32 %v1733_v23 }
 0x390   :  { %v1064_v41 = vpop.f32.mrf.mxu3  ;;  %v1044_v51 = vpop.f32.mrf.mxu2 }
 0x391   :  { %v1070_v30 = vadd.f32 %v1064_v41, %v3457_v50  ;;  %v1069_v10 = vadd.f32 %v1044_v51, %v3458_v55 }
 0x393   :  { %v1734_v45 = vmul.f32 -1.442695, %v1070_v30 }
 0x394   :  { %v1821_v28 = vpop.eup %1820 }
 0x395   :  { %v1823_v1 = vpop.eup %1822  ;;  %v1074_v35 = vadd.f32 1.0, %v1821_v28  ;;  %1824 = vpow2.f32 %v1734_v45 }
 0x396   :  { %v1093_v47 = vadd.f32 1.0, %v1823_v1 }
 0x397   :  { %1826 = vrcp.f32 %v1074_v35  ;;  %v1086_v30 = vand.u32 2147483648, %v1074_v35  ;;  %v1084_v1 = vand.u32 2147483647, %v1074_v35  ;;  %vm1080_vm3 = vweird.f32 %v1074_v35 }
 0x398   :  { %1828 = vrcp.f32 %v1093_v47  ;;  %v1105_v50 = vand.u32 2147483648, %v1093_v47  ;;  %v1103_v42 = vand.u32 2147483647, %v1093_v47  ;;  %vm1099_vm4 = vweird.f32 %v1093_v47 }
 0x399   :  { %v1087_v51 = vor.u32 1.1754944e-38, %v1086_v30  ;;  %vm1085_vm7 = vcmp.eq.f32.partialorder %v1084_v1, 8.507059e+37 }
 0x39a   :  { %vm1104_vm8 = vcmp.eq.f32.partialorder %v1103_v42, 8.507059e+37 }
 0x39b   :  { %v1825_v13 = vpop.eup %1824 }
 0x39c   :  { %v1113_v43 = vadd.f32 1.0, %v1825_v13 }
 0x39d   :  { %v1827_v39 = vpop.eup %1826 }
 0x39e   :  { %v1829_v62 = vpop.eup %1828  ;;  %v1076_v34 = vmul.f32 %v1827_v39, %v1074_v35  ;;  %1830 = vrcp.f32 %v1113_v43  ;;  %vm1081_vm1 = vweird.f32 %v1827_v39  ;;  %v1125_v30 = vand.u32 2147483648, %v1113_v43 }
 0x39f   :  { %v1095_v2 = vmul.f32 %v1829_v62, %v1093_v47  ;;  %1832 = vtanh.f32 %v1069_v10  ;;  %vm1100_vm2 = vweird.f32 %v1829_v62  ;;  %vm1082_vm5 = vmor %vm1080_vm3, %vm1081_vm1  ;;  %vm1119_vm10 = vweird.f32 %v1113_v43 }
 0x3a0   :  { %v1077_v23 = vsub.f32 1.0, %v1076_v34  ;;  %vm1101_vm6 = vmor %vm1099_vm4, %vm1100_vm2  ;;  %v1106_v34 = vor.u32 1.1754944e-38, %v1105_v50  ;;  %v1126_v1 = vor.u32 1.1754944e-38, %v1125_v30 }
 0x3a1   :  { %v1096_v41 = vsub.f32 1.0, %v1095_v2 }
 0x3a2   :  { %v1078_v28 = vmul.f32 %v1827_v39, %v1077_v23 }
 0x3a3   :  { %v1097_v45 = vmul.f32 %v1829_v62, %v1096_v41 }
 0x3a4   :  { %v1831_v44 = vpop.eup %1830  ;;  %v1079_v13 = vadd.f32 %v1827_v39, %v1078_v28 }
 0x3a5   :  { %v1098_v55 = vadd.f32 %v1829_v62, %v1097_v45  ;;  %v1115_v4 = vmul.f32 %v1831_v44, %v1113_v43  ;;  %v1833_v10 = vpop.eup %1832  ;;  %vm1120_vm9 = vweird.f32 %v1831_v44 }
 0x3a6   :  { %v1083_v2 = vsel %vm1082_vm5, %v1827_v39, %v1079_v13  ;;  %v1123_v39 = vand.u32 2147483647, %v1113_v43  ;;  %vm1121_vm11 = vmor %vm1119_vm10, %vm1120_vm9 }
 0x3a7   :  { %v1088_v5 = vsel %vm1085_vm7, %v1087_v51, %v1083_v2  ;;  %v1102_v23 = vsel %vm1101_vm6, %v1829_v62, %v1098_v55  ;;  %v1116_v8 = vsub.f32 1.0, %v1115_v4  ;;  %v3489_v55 = vld [vmem:[#allocation50_spill] sm:$0xff] }
 0x3a8   :  { %v1107_v41 = vsel %vm1104_vm8, %v1106_v34, %v1102_v23  ;;  %v1130_v48 = vmul.f32 %v1833_v10, %v1088_v5  ;;  %vm1124_vm12 = vcmp.eq.f32.partialorder %v1123_v39, 8.507059e+37 }
 0x3a9   :  { %v1129_v40 = vmul.f32 %v1107_v41, %v2984_v18  ;;  %v1117_v28 = vmul.f32 %v1831_v44, %v1116_v8 }
 0x3ab   :  { %v3063_v35 = vadd.f32 %v1130_v48, %v1129_v40  ;;  %v1118_v47 = vadd.f32 %v1831_v44, %v1117_v28 }
 0x3ad   :  { %1834 = vtanh.f32 %v3063_v35  ;;  %v1122_v50 = vsel %vm1121_vm11, %v1831_v44, %v1118_v47 }
 0x3ae   :  { %v1127_v4 = vsel %vm1124_vm12, %v1126_v1, %v1122_v50 }
 0x3b3   :  { %v1835_v42 = vpop.eup %1834 }
 0x3b4   :  { %v3066_v62 = vmul.f32 %v1835_v42, %v1127_v4 }
 0x3b6   :  { %1155 = vmatmul.f32.vlgmr.msrb.gmra.mxu0 %v3066_v62  ;;  %1175 = vmatmul.f32.vlgmr.msrb.gmra.mxu1 %v3066_v62 }
 0x3b7   :  { %1195 = vmatmul.f32.vlgmr.msrb.gmra.mxu2 %v3066_v62  ;;  %1215 = vmatmul.f32.vlgmr.msrb.gmra.mxu3 %v3066_v62 }
 0x3b8   :  { %1443 = vmatpush.msrb.mxu0 %v2707_v53  ;;  %1463 = vmatpush.msrb.mxu1 %v2710_v11  ;;  %v3459_v53 = vld [vmem:[#allocation36_spill] sm:$0xff] }
 0x3b9   :  { %1483 = vmatpush.msrb.mxu2 %v2876_v56  ;;  %1503 = vmatpush.msrb.mxu3 %v2714_v59  ;;  %v3460_v11 = vld [vmem:[#allocation32_spill] sm:$0xff]  ;;  %v3461_v59 = vld [vmem:[#allocation22_spill] sm:$0xff] }
 0x3ba   :  { %1444 = vmatpush.msrb.mxu0 %v2717_v49  ;;  %1464 = vmatpush.msrb.mxu1 %v2720_v58  ;;  %v3462_v49 = vld [vmem:[#allocation15_spill] sm:$0xff]  ;;  %v3463_v58 = vld [vmem:[#allocation30_spill] sm:$0xff] }
 0x3bb   :  { %1484 = vmatpush.msrb.mxu2 %v2882_v52  ;;  %1504 = vmatpush.msrb.mxu3 %v2724_v33  ;;  %v3464_v33 = vld [vmem:[#allocation21_spill] sm:$0xff] }
 0x3bc   :  { %1445 = vmatpush.msrb.mxu0 %v2727_v31  ;;  %1465 = vmatpush.msrb.mxu1 %v2730_v54  ;;  %v3465_v31 = vld [vmem:[#allocation33_spill] sm:$0xff]  ;;  %v3466_v54 = vld [vmem:[#allocation24_spill] sm:$0xff] }
 0x3bd   :  { %1485 = vmatpush.msrb.mxu2 %v2888_v19  ;;  %1505 = vmatpush.msrb.mxu3 %v2734_v9  ;;  %v3467_v9 = vld [vmem:[#allocation20_spill] sm:$0xff] }
 0x3be   :  { %1446 = vmatpush.msrb.mxu0 %v2737_v12  ;;  %1466 = vmatpush.msrb.mxu1 %v2740_v57  ;;  %v3468_v12 = vld [vmem:[#allocation16_spill] sm:$0xff]  ;;  %v3469_v57 = vld [vmem:[#allocation23_spill] sm:$0xff] }
 0x3bf   :  { %1486 = vmatpush.msrb.mxu2 %v2894_v17  ;;  %1506 = vmatpush.msrb.mxu3 %v2744_v14  ;;  %v3470_v14 = vld [vmem:[#allocation34_spill] sm:$0xff]  ;;  %v3487_v17 = vld [vmem:[#allocation52_spill] sm:$0xff] }
 0x3c0   :  { %1447 = vmatpush.msrb.mxu0 %v2747_v15  ;;  %1467 = vmatpush.msrb.mxu1 %v2750_v60  ;;  %v3471_v15 = vld [vmem:[#allocation27_spill] sm:$0xff]  ;;  %v3472_v60 = vld [vmem:[#allocation37_spill] sm:$0xff] }
 0x3c1   :  { %1487 = vmatpush.msrb.mxu2 %v2900_v0  ;;  %1507 = vmatpush.msrb.mxu3 %v2754_v16  ;;  %v3473_v16 = vld [vmem:[#allocation28_spill] sm:$0xff] }
 0x3c2   :  { %1448 = vmatpush.msrb.mxu0 %v2757_v20  ;;  %1468 = vmatpush.msrb.mxu1 %v2760_v61  ;;  %v3474_v20 = vld [vmem:[#allocation17_spill] sm:$0xff]  ;;  %v3475_v61 = vld [vmem:[#allocation31_spill] sm:$0xff] }
 0x3c3   :  { %1488 = vmatpush.msrb.mxu2 %v2906_v24  ;;  %1508 = vmatpush.msrb.mxu3 %v2764_v21  ;;  %v3476_v21 = vld [vmem:[#allocation41_spill] sm:$0xff] }
 0x3c4   :  { %1449 = vmatpush.msrb.mxu0 %v2767_v22  ;;  %1469 = vmatpush.msrb.mxu1 %v2770_v63  ;;  %v3477_v22 = vld [vmem:[#allocation25_spill] sm:$0xff]  ;;  %v3478_v63 = vld [vmem:[#allocation35_spill] sm:$0xff] }
 0x3c5   :  { %1489 = vmatpush.msrb.mxu2 %v2912_v27  ;;  %1509 = vmatpush.msrb.mxu3 %v2774_v25  ;;  %v3479_v25 = vld [vmem:[#allocation48_spill] sm:$0xff] }
 0x3c6   :  { %1450 = vmatpush.msrb.mxu0 %v2777_v26  ;;  %1470 = vmatpush.msrb.mxu1 %v2780_v3  ;;  %v3480_v26 = vld [vmem:[#allocation40_spill] sm:$0xff]  ;;  %v3481_v3 = vld [vmem:[#allocation29_spill] sm:$0xff] }
 0x3c7   :  { %1490 = vmatpush.msrb.mxu2 %v2918_v38  ;;  %1510 = vmatpush.msrb.mxu3 %v2784_v29  ;;  %v3482_v29 = vld [vmem:[#allocation19_spill] sm:$0xff] }
 0x3c8   :  { %1451 = vmatpush.msrb.mxu0 %v2787_v32  ;;  %1471 = vmatpush.msrb.mxu1 %v2790_v6  ;;  %v3483_v32 = vld [vmem:[#allocation44_spill] sm:$0xff]  ;;  %v3484_v6 = vld [vmem:[#allocation51_spill] sm:$0xff] }
 0x3c9   :  { %1491 = vmatpush.msrb.mxu2 %v2924_v46  ;;  %1511 = vmatpush.msrb.mxu3 %v2794_v36  ;;  %v3485_v36 = vld [vmem:[#allocation59_spill] sm:$0xff]  ;;  %v3488_v46 = vld [vmem:[#allocation60_spill] sm:$0xff] }
 0x3ca   :  { %1452 = vmatpush.msrb.mxu0 %v2797_v37  ;;  %1472 = vmatpush.msrb.mxu1 %v2800_v7  ;;  %v3486_v37 = vld [vmem:[#allocation38_spill] sm:$0xff] }
 0x3cb   :  { %1492 = vmatpush.msrb.mxu2 %v3459_v53  ;;  %1512 = vmatpush.msrb.mxu3 %v3460_v11  ;;  %v146_v7 = vadd.f32 %v3486_v37, %v3485_v36  ;;  %v1610_v37 = vld [vmem:[#allocation7 + $0x58] sm:$0xff] }
 0x3cc   :  { %1453 = vmatpush.msrb.mxu0 %v3461_v59  ;;  %1473 = vmatpush.msrb.mxu1 %v3462_v49 }
 0x3cd   :  { %1493 = vmatpush.msrb.mxu2 %v3463_v58  ;;  %1513 = vmatpush.msrb.mxu3 %v3464_v33 }
 0x3ce   :  { %1454 = vmatpush.msrb.mxu0 %v3465_v31  ;;  %1474 = vmatpush.msrb.mxu1 %v3466_v54 }
 0x3cf   :  { %1494 = vmatpush.msrb.mxu2 %v3467_v9  ;;  %1514 = vmatpush.msrb.mxu3 %v3468_v12 }
 0x3d0   :  { %1455 = vmatpush.msrb.mxu0 %v3469_v57  ;;  %1475 = vmatpush.msrb.mxu1 %v3470_v14 }
 0x3d1   :  { %1495 = vmatpush.msrb.mxu2 %v3471_v15  ;;  %1515 = vmatpush.msrb.mxu3 %v3472_v60 }
 0x3d2   :  { %1456 = vmatpush.msrb.mxu0 %v3473_v16  ;;  %1476 = vmatpush.msrb.mxu1 %v3474_v20 }
 0x3d3   :  { %1496 = vmatpush.msrb.mxu2 %v3475_v61  ;;  %1516 = vmatpush.msrb.mxu3 %v3476_v21 }
 0x3d4   :  { %1457 = vmatpush.msrb.mxu0 %v3477_v22  ;;  %1477 = vmatpush.msrb.mxu1 %v3478_v63 }
 0x3d5   :  { %1497 = vmatpush.msrb.mxu2 %v3479_v25  ;;  %1517 = vmatpush.msrb.mxu3 %v3480_v26 }
 0x3d6   :  { %1458 = vmatpush.msrb.mxu0 %v3481_v3  ;;  %1478 = vmatpush.msrb.mxu1 %v3482_v29  ;;  %v1613_v29 = vld [vmem:[#allocation7 + $0x70] sm:$0xff] }
 0x3d7   :  { %1498 = vmatpush.msrb.mxu2 %v3483_v32  ;;  %1518 = vmatpush.msrb.mxu3 %v3484_v6  ;;  %v1612_v32 = vld [vmem:[#allocation7 + $0x68] sm:$0xff]  ;;  %v1611_v6 = vld [vmem:[#allocation7 + $0x60] sm:$0xff] }
 0x433   :  { %v1156_v56 = vpop.f32.mrf.mxu0  ;;  %v1176_v52 = vpop.f32.mrf.mxu1 }
 0x434   :  { %v1219_v19 = vadd.f32 %v1156_v56, %v146_v7  ;;  %v1220_v0 = vadd.f32 %v1176_v52, %v3487_v17  ;;  %v3490_v7 = vld [vmem:[#allocation39_spill] sm:$0xff] }
 0x435   :  { %v149_v56 = vadd.f32 %v3490_v7, %v3485_v36  ;;  %v1609_v17 = vld [vmem:[#allocation7 + $0x50] sm:$0xff] }
 0x436   :  { %v1735_v24 = vmul.f32 -1.442695, %v1219_v19  ;;  %v1736_v27 = vmul.f32 -1.442695, %v1220_v0 }
 0x438   :  { %1836 = vpow2.f32 %v1735_v24  ;;  %v3491_v24 = vld [vmem:[#allocation55_spill] sm:$0xff] }
 0x439   :  { %1838 = vpow2.f32 %v1736_v27 }
 0x43a   :  { %v1216_v38 = vpop.f32.mrf.mxu3  ;;  %v1196_v43 = vpop.f32.mrf.mxu2 }
 0x43b   :  { %v1222_v18 = vadd.f32 %v1216_v38, %v3488_v46  ;;  %v1221_v34 = vadd.f32 %v1196_v43, %v3489_v55  ;;  %v1608_v38 = vld [vmem:[#allocation7 + $0x48] sm:$0xff] }
 0x43d   :  { %v1737_v40 = vmul.f32 -1.442695, %v1222_v18 }
 0x43e   :  { %v1837_v48 = vpop.eup %1836 }
 0x43f   :  { %v1839_v8 = vpop.eup %1838  ;;  %v1226_v5 = vadd.f32 1.0, %v1837_v48  ;;  %1840 = vpow2.f32 %v1737_v40  ;;  %v1607_v40 = vld [vmem:[#allocation7 + $0x40] sm:$0xff]  ;;  %v1606_v48 = vld [vmem:[#allocation7 + $0x38] sm:$0xff] }
 0x440   :  { %v1245_v44 = vadd.f32 1.0, %v1839_v8  ;;  %v1605_v8 = vld [vmem:[#allocation7 + $0x30] sm:$0xff] }
 0x441   :  { %1842 = vrcp.f32 %v1226_v5  ;;  %v1238_v47 = vand.u32 2147483648, %v1226_v5  ;;  %v1236_v50 = vand.u32 2147483647, %v1226_v5  ;;  %vm1232_vm15 = vweird.f32 %v1226_v5 }
 0x442   :  { %1844 = vrcp.f32 %v1245_v44  ;;  %v1257_v30 = vand.u32 2147483648, %v1245_v44  ;;  %v1255_v42 = vand.u32 2147483647, %v1245_v44  ;;  %vm1251_vm0 = vweird.f32 %v1245_v44 }
 0x443   :  { %v1239_v11 = vor.u32 1.1754944e-38, %v1238_v47  ;;  %vm1237_vm3 = vcmp.eq.f32.partialorder %v1236_v50, 8.507059e+37 }
 0x444   :  { %v1258_v58 = vor.u32 1.1754944e-38, %v1257_v30  ;;  %vm1256_vm4 = vcmp.eq.f32.partialorder %v1255_v42, 8.507059e+37  ;;  %v3493_v42 = vld [vmem:[#allocation53_spill] sm:$0xff] }
 0x445   :  { %v1841_v45 = vpop.eup %1840 }
 0x446   :  { %v1265_v13 = vadd.f32 1.0, %v1841_v45  ;;  %v1604_v45 = vld [vmem:[#allocation7 + $0x28] sm:$0xff] }
 0x447   :  { %v1843_v51 = vpop.eup %1842 }
 0x448   :  { %v1845_v2 = vpop.eup %1844  ;;  %v1228_v10 = vmul.f32 %v1843_v51, %v1226_v5  ;;  %1846 = vrcp.f32 %v1265_v13  ;;  %vm1233_vm13 = vweird.f32 %v1843_v51  ;;  %v1277_v61 = vand.u32 2147483648, %v1265_v13 }
 0x449   :  { %v1247_v23 = vmul.f32 %v1845_v2, %v1245_v44  ;;  %1848 = vtanh.f32 %v1221_v34  ;;  %vm1252_vm14 = vweird.f32 %v1845_v2  ;;  %vm1234_vm1 = vmor %vm1232_vm15, %vm1233_vm13  ;;  %vm1271_vm6 = vweird.f32 %v1265_v13  ;;  %v3492_v44 = vld [vmem:[#allocation61_spill] sm:$0xff] }
 0x44a   :  { %v1229_v41 = vsub.f32 1.0, %v1228_v10  ;;  %vm1253_vm2 = vmor %vm1251_vm0, %vm1252_vm14  ;;  %v1275_v21 = vand.u32 2147483647, %v1265_v13  ;;  %v1278_v63 = vor.u32 1.1754944e-38, %v1277_v61 }
 0x44b   :  { %v1248_v28 = vsub.f32 1.0, %v1247_v23  ;;  %v1602_v23 = vld [vmem:[#allocation7 + $0x18] sm:$0xff] }
 0x44c   :  { %v1230_v39 = vmul.f32 %v1843_v51, %v1229_v41  ;;  %vm1276_vm8 = vcmp.eq.f32.partialorder %v1275_v21, 8.507059e+37  ;;  %v1601_v41 = vld [vmem:[#allocation7 + $0x10] sm:$0xff] }
 0x44d   :  { %v1249_v1 = vmul.f32 %v1845_v2, %v1248_v28  ;;  %v1600_v28 = vld [vmem:[#allocation7 + $0x8] sm:$0xff] }
 0x44e   :  { %v1847_v4 = vpop.eup %1846  ;;  %v1231_v53 = vadd.f32 %v1843_v51, %v1230_v39  ;;  %v1599_v39 = vld [vmem:[#allocation7] sm:$0xff] }
 0x44f   :  { %v1250_v59 = vadd.f32 %v1845_v2, %v1249_v1  ;;  %v1267_v49 = vmul.f32 %v1847_v4, %v1265_v13  ;;  %v1849_v31 = vpop.eup %1848  ;;  %vm1272_vm5 = vweird.f32 %v1847_v4 }
 0x450   :  { %v1235_v33 = vsel %vm1234_vm1, %v1843_v51, %v1231_v53  ;;  %vm1273_vm7 = vmor %vm1271_vm6, %vm1272_vm5  ;;  %v1603_v51 = vld [vmem:[#allocation7 + $0x20] sm:$0xff] }
 0x451   :  { %v1240_v54 = vsel %vm1237_vm3, %v1239_v11, %v1235_v33  ;;  %v1254_v9 = vsel %vm1253_vm2, %v1845_v2, %v1250_v59  ;;  %v1268_v12 = vsub.f32 1.0, %v1267_v49 }
 0x452   :  { %v1259_v57 = vsel %vm1256_vm4, %v1258_v58, %v1254_v9  ;;  %v1282_v14 = vmul.f32 %v1849_v31, %v1240_v54 }
 0x453   :  { %v1281_v15 = vmul.f32 %v1259_v57, %v3063_v35  ;;  %v1269_v60 = vmul.f32 %v1847_v4, %v1268_v12  ;;  %v1614_v35 = vld [vmem:[#allocation7 + $0x78] sm:$0xff] }
 0x455   :  { %v3142_v16 = vadd.f32 %v1282_v14, %v1281_v15  ;;  %v1270_v20 = vadd.f32 %v1847_v4, %v1269_v60 }
 0x457   :  { %1850 = vtanh.f32 %v3142_v16  ;;  %v1274_v22 = vsel %vm1273_vm7, %v1847_v4, %v1270_v20 }
 0x458   :  { %v1279_v26 = vsel %vm1276_vm8, %v1278_v63, %v1274_v22 }
 0x45d   :  { %v1851_v25 = vpop.eup %1850 }
 0x45e   :  { %v3145_v3 = vmul.f32 %v1851_v25, %v1279_v26 }
 0x460   :  { %1307 = vmatmul.f32.vlgmr.msra.gmra.mxu0 %v3145_v3  ;;  %1327 = vmatmul.f32.vlgmr.msra.gmra.mxu1 %v3145_v3 }
 0x461   :  { %1347 = vmatmul.f32.vlgmr.msra.gmra.mxu2 %v3145_v3  ;;  %1367 = vmatmul.f32.vlgmr.msra.gmra.mxu3 %v3145_v3 }
 0x462   :  { %1619 = vmatpush.msra.mxu0 %v1614_v35 }
 0x464   :  { %1620 = vmatpush.msra.mxu0 %v1613_v29 }
 0x466   :  { %1621 = vmatpush.msra.mxu0 %v1612_v32 }
 0x468   :  { %1622 = vmatpush.msra.mxu0 %v1611_v6 }
 0x46a   :  { %1623 = vmatpush.msra.mxu0 %v1610_v37 }
 0x46c   :  { %1624 = vmatpush.msra.mxu0 %v1609_v17 }
 0x46e   :  { %1625 = vmatpush.msra.mxu0 %v1608_v38 }
 0x470   :  { %1626 = vmatpush.msra.mxu0 %v1607_v40  ;;  %v3497_v40 = vld [vmem:[#allocation43_spill] sm:$0xff] }
 0x472   :  { %1627 = vmatpush.msra.mxu0 %v1606_v48  ;;  %v3498_v48 = vld [vmem:[#allocation42_spill] sm:$0xff] }
 0x474   :  { %1628 = vmatpush.msra.mxu0 %v1605_v8  ;;  %v152_v8 = vadd.f32 %v3498_v48, %v3485_v36 }
 0x476   :  { %1629 = vmatpush.msra.mxu0 %v1604_v45  ;;  %v3499_v45 = vld [vmem:[#allocation58_spill] sm:$0xff] }
 0x478   :  { %1630 = vmatpush.msra.mxu0 %v1603_v51 }
 0x47a   :  { %1631 = vmatpush.msra.mxu0 %v1602_v23 }
 0x47c   :  { %1632 = vmatpush.msra.mxu0 %v1601_v41 }
 0x47e   :  { %1633 = vmatpush.msra.mxu0 %v1600_v28 }
 0x480   :  { %1634 = vmatpush.msra.mxu0 %v1599_v39 }
 0x4dd   :  { %v1308_v52 = vpop.f32.mrf.mxu0  ;;  %v1328_v19 = vpop.f32.mrf.mxu1 }
 0x4de   :  { %v1371_v0 = vadd.f32 %v1308_v52, %v149_v56  ;;  %v1372_v27 = vadd.f32 %v1328_v19, %v3491_v24 }
 0x4e0   :  { %v1738_v46 = vmul.f32 -1.442695, %v1371_v0  ;;  %v1739_v18 = vmul.f32 -1.442695, %v1372_v27 }
 0x4e2   :  { %1852 = vpow2.f32 %v1738_v46  ;;  %v3495_v46 = vld [vmem:[#allocation18_spill] sm:$0xff] }
 0x4e3   :  { %1854 = vpow2.f32 %v1739_v18  ;;  %v3496_v18 = vld [vmem:[#allocation26_spill] sm:$0xff] }
 0x4e4   :  { %v1368_v5 = vpop.f32.mrf.mxu3  ;;  %v1348_v47 = vpop.f32.mrf.mxu2 }
 0x4e5   :  { %v1374_v43 = vadd.f32 %v1368_v5, %v3492_v44  ;;  %v1373_v4 = vadd.f32 %v1348_v47, %v3493_v42 }
 0x4e7   :  { %v1740_v13 = vmul.f32 -1.442695, %v1374_v43 }
 0x4e8   :  { %v1853_v55 = vpop.eup %1852 }
 0x4e9   :  { %v1855_v34 = vpop.eup %1854  ;;  %v1378_v2 = vadd.f32 1.0, %v1853_v55  ;;  %1856 = vpow2.f32 %v1740_v13 }
 0x4ea   :  { %v1397_v10 = vadd.f32 1.0, %v1855_v34  ;;  %v3172_v34 = vld [vmem:[%s3198_s7] ss:$0 sm:$0xff]  ;;  %s2032_s7 = smov [#allocation9]  }
 0x4eb   :  { %1858 = vrcp.f32 %v1378_v2  ;;  %v1390_v33 = vand.u32 2147483648, %v1378_v2  ;;  %v1388_v9 = vand.u32 2147483647, %v1378_v2  ;;  %vm1384_vm11 = vweird.f32 %v1378_v2  ;;  %s1672_s30 = sshll.u32 %s2032_s7, 4  ;;  %s1673_s30 = int_to_ptr.vmem [resolvable:$true] %s1672_s30 }
 0x4ec   :  { %1860 = vrcp.f32 %v1397_v10  ;;  %v1409_v31 = vand.u32 2147483648, %v1397_v10  ;;  %v1407_v57 = vand.u32 2147483647, %v1397_v10  ;;  %vm1403_vm12 = vweird.f32 %v1397_v10 }
 0x4ed   :  { %v1391_v60 = vor.u32 1.1754944e-38, %v1390_v33  ;;  %vm1389_vm15 = vcmp.eq.f32.partialorder %v1388_v9, 8.507059e+37 }
 0x4ee   :  { %v1410_v21 = vor.u32 1.1754944e-38, %v1409_v31  ;;  %vm1408_vm0 = vcmp.eq.f32.partialorder %v1407_v57, 8.507059e+37 }
 0x4ef   :  { %v1857_v30 = vpop.eup %1856 }
 0x4f0   :  { %v1417_v50 = vadd.f32 1.0, %v1857_v30 }
 0x4f1   :  { %v1859_v1 = vpop.eup %1858 }
 0x4f2   :  { %v1861_v53 = vpop.eup %1860  ;;  %v1380_v11 = vmul.f32 %v1859_v1, %v1378_v2  ;;  %1862 = vrcp.f32 %v1417_v50  ;;  %vm1385_vm9 = vweird.f32 %v1859_v1  ;;  %v1429_v52 = vand.u32 2147483648, %v1417_v50 }
 0x4f3   :  { %v1399_v59 = vmul.f32 %v1861_v53, %v1397_v10  ;;  %1864 = vtanh.f32 %v1373_v4  ;;  %vm1404_vm10 = vweird.f32 %v1861_v53  ;;  %vm1386_vm13 = vmor %vm1384_vm11, %vm1385_vm9  ;;  %vm1423_vm2 = vweird.f32 %v1417_v50 }
 0x4f4   :  { %v1381_v49 = vsub.f32 1.0, %v1380_v11  ;;  %vm1405_vm14 = vmor %vm1403_vm12, %vm1404_vm10  ;;  %v1427_v19 = vand.u32 2147483647, %v1417_v50  ;;  %v1430_v0 = vor.u32 1.1754944e-38, %v1429_v52  ;;  %v3501_v11 = vld [vmem:[#allocation56_spill] sm:$0xff] }
 0x4f5   :  { %v1400_v58 = vsub.f32 1.0, %v1399_v59 }
 0x4f6   :  { %v1382_v54 = vmul.f32 %v1859_v1, %v1381_v49  ;;  %vm1428_vm4 = vcmp.eq.f32.partialorder %v1427_v19, 8.507059e+37 }
 0x4f7   :  { %v1401_v12 = vmul.f32 %v1861_v53, %v1400_v58 }
 0x4f8   :  { %v1863_v14 = vpop.eup %1862  ;;  %v1383_v15 = vadd.f32 %v1859_v1, %v1382_v54 }
 0x4f9   :  { %v1402_v20 = vadd.f32 %v1861_v53, %v1401_v12  ;;  %v1419_v61 = vmul.f32 %v1863_v14, %v1417_v50  ;;  %v1865_v63 = vpop.eup %1864  ;;  %vm1424_vm1 = vweird.f32 %v1863_v14 }
 0x4fa   :  { %v1387_v22 = vsel %vm1386_vm13, %v1859_v1, %v1383_v15  ;;  %vm1425_vm3 = vmor %vm1423_vm2, %vm1424_vm1 }
 0x4fb   :  { %v1392_v25 = vsel %vm1389_vm15, %v1391_v60, %v1387_v22  ;;  %v1406_v26 = vsel %vm1405_vm14, %v1861_v53, %v1402_v20  ;;  %v1420_v35 = vsub.f32 1.0, %v1419_v61 }
 0x4fc   :  { %v1411_v29 = vsel %vm1408_vm0, %v1410_v21, %v1406_v26  ;;  %v1434_v32 = vmul.f32 %v1865_v63, %v1392_v25 }
 0x4fd   :  { %v1433_v6 = vmul.f32 %v1411_v29, %v3142_v16  ;;  %v1421_v37 = vmul.f32 %v1863_v14, %v1420_v35  ;;  %v3494_v16 = vld [vmem:[#allocation63_spill] sm:$0xff] }
 0x4ff   :  { %v3157_v7 = vadd.f32 %v1434_v32, %v1433_v6  ;;  %v1422_v56 = vadd.f32 %v1863_v14, %v1421_v37 }
 0x501   :  { %1866 = vtanh.f32 %v3157_v7  ;;  %v1426_v17 = vsel %vm1425_vm3, %v1863_v14, %v1422_v56 }
 0x502   :  { %v1431_v27 = vsel %vm1428_vm4, %v1430_v0, %v1426_v17 }
 0x507   :  { %v1867_v24 = vpop.eup %1866 }
 0x508   :  { %v1437_v38 = vmul.f32 %v1867_v24, %v1431_v27 }
 0x50a   :  { %1459 = vmatmul.f32.vlgmr.msrb.gmra.mxu0 %v1437_v38  ;;  %1479 = vmatmul.f32.vlgmr.msrb.gmra.mxu1 %v1437_v38 }
 0x50b   :  { %1499 = vmatmul.f32.vlgmr.msrb.gmra.mxu2 %v1437_v38  ;;  %1519 = vmatmul.f32.vlgmr.msrb.gmra.mxu3 %v1437_v38 }
 0x512   :  { %1635 = vmatmul.f32.vlgmr.msra.gmra.mxu0 %v3494_v16 }
 0x51a   :  { %1638 = vmatmul.f32.gmra.mxu0 %v3495_v46 }
 0x522   :  { %1641 = vmatmul.f32.gmra.mxu0 %v3496_v18 }
 0x52a   :  { %1644 = vmatmul.f32.gmra.mxu0 %v3497_v40 }
 0x532   :  { %1647 = vmatmul.f32.gmra.mxu0 %v3066_v62 }
 0x53a   :  { %1650 = vmatmul.f32.gmra.mxu0 %v3145_v3  ;;  %v3500_v3 = vld [vmem:[#allocation62_spill] sm:$0xff] }
 0x542   :  { %1653 = vmatmul.f32.gmra.mxu0 %v1437_v38 }
 0x587   :  { %v1460_v5 = vpop.f32.mrf.mxu0  ;;  %v1480_v44 = vpop.f32.mrf.mxu1 }
 0x588   :  { %v1523_v43 = vadd.f32 %v1460_v5, %v152_v8  ;;  %v1524_v13 = vadd.f32 %v1480_v44, %v3499_v45 }
 0x58a   :  { %v1741_v51 = vmul.f32 -1.442695, %v1523_v43  ;;  %v1742_v55 = vmul.f32 -1.442695, %v1524_v13 }
 0x58c   :  { %1868 = vpow2.f32 %v1741_v51 }
 0x58d   :  { %1870 = vpow2.f32 %v1742_v55 }
 0x58e   :  { %v1520_v62 = vpop.f32.mrf.mxu3  ;;  %v1500_v50 = vpop.f32.mrf.mxu2 }
 0x58f   :  { %v1526_v2 = vadd.f32 %v1520_v62, %v3500_v3  ;;  %v1636_v10 = vpop.f32.mrf.mxu0  ;;  %v1525_v59 = vadd.f32 %v1500_v50, %v3501_v11 }
 0x590   :  { %v1637_v36 = vadd.f32 %v3172_v34, %v1636_v10 }
 0x591   :  { %v1743_v23 = vmul.f32 -1.442695, %v1526_v2 }
 0x592   :  { %v1869_v41 = vpop.eup %1868  ;;  %1660 = vst [vmem:[#allocation9] sm:$0xff] %v1637_v36 }
 0x593   :  { %v1871_v28 = vpop.eup %1870  ;;  %v1530_v47 = vadd.f32 1.0, %v1869_v41  ;;  %1872 = vpow2.f32 %v1743_v23 }
 0x594   :  { %v1549_v30 = vadd.f32 1.0, %v1871_v28 }
 0x595   :  { %1874 = vrcp.f32 %v1530_v47  ;;  %v1540_v9 = vand.u32 2147483647, %v1530_v47  ;;  %v1542_v12 = vand.u32 2147483648, %v1530_v47  ;;  %vm1536_vm7 = vweird.f32 %v1530_v47 }
 0x596   :  { %1876 = vrcp.f32 %v1549_v30  ;;  %v1561_v14 = vand.u32 2147483648, %v1549_v30  ;;  %v1559_v61 = vand.u32 2147483647, %v1549_v30  ;;  %vm1555_vm8 = vweird.f32 %v1549_v30 }
 0x597   :  { %v1639_v39 = vpop.f32.mrf.mxu0  ;;  %v1543_v63 = vor.u32 1.1754944e-38, %v1542_v12  ;;  %vm1541_vm10 = vcmp.eq.f32.partialorder %v1540_v9, 8.507059e+37 }
 0x598   :  { %v1640_v1 = vadd.f32 %v3172_v34, %v1639_v39  ;;  %v1562_v35 = vor.u32 1.1754944e-38, %v1561_v14  ;;  %vm1560_vm12 = vcmp.eq.f32.partialorder %v1559_v61, 8.507059e+37 }
 0x599   :  { %v1873_v42 = vpop.eup %1872 }
 0x59a   :  { %v1569_v4 = vadd.f32 1.0, %v1873_v42  ;;  %1661 = vst [vmem:[#allocation9 + $0x8] sm:$0xff] %v1640_v1 }
 0x59b   :  { %v1875_v53 = vpop.eup %1874 }
 0x59c   :  { %v1877_v49 = vpop.eup %1876  ;;  %v1532_v58 = vmul.f32 %v1875_v53, %v1530_v47  ;;  %1878 = vrcp.f32 %v1569_v4  ;;  %vm1537_vm5 = vweird.f32 %v1875_v53  ;;  %v1581_v46 = vand.u32 2147483648, %v1569_v4 }
 0x59d   :  { %v1551_v33 = vmul.f32 %v1877_v49, %v1549_v30  ;;  %1880 = vtanh.f32 %v1525_v59  ;;  %vm1556_vm6 = vweird.f32 %v1877_v49  ;;  %vm1538_vm9 = vmor %vm1536_vm7, %vm1537_vm5  ;;  %vm1575_vm14 = vweird.f32 %v1569_v4 }
 0x59e   :  { %v1533_v31 = vsub.f32 1.0, %v1532_v58  ;;  %vm1557_vm11 = vmor %vm1555_vm8, %vm1556_vm6  ;;  %v1579_v18 = vand.u32 2147483647, %v1569_v4  ;;  %v1582_v8 = vor.u32 1.1754944e-38, %v1581_v46 }
 0x59f   :  { %v1552_v54 = vsub.f32 1.0, %v1551_v33  ;;  %v1642_v57 = vpop.f32.mrf.mxu0 }
 0x5a0   :  { %v1534_v15 = vmul.f32 %v1875_v53, %v1533_v31  ;;  %v1643_v60 = vadd.f32 %v3172_v34, %v1642_v57  ;;  %vm1580_vm0 = vcmp.eq.f32.partialorder %v1579_v18, 8.507059e+37 }
 0x5a1   :  { %v1553_v20 = vmul.f32 %v1877_v49, %v1552_v54 }
 0x5a2   :  { %v1879_v21 = vpop.eup %1878  ;;  %v1535_v22 = vadd.f32 %v1875_v53, %v1534_v15  ;;  %1662 = vst [vmem:[#allocation9 + $0x10] sm:$0xff] %v1643_v60 }
 0x5a3   :  { %v1554_v25 = vadd.f32 %v1877_v49, %v1553_v20  ;;  %v1571_v26 = vmul.f32 %v1879_v21, %v1569_v4  ;;  %v1881_v32 = vpop.eup %1880  ;;  %vm1576_vm13 = vweird.f32 %v1879_v21 }
 0x5a4   :  { %v1539_v29 = vsel %vm1538_vm9, %v1875_v53, %v1535_v22  ;;  %vm1577_vm15 = vmor %vm1575_vm14, %vm1576_vm13 }
 0x5a5   :  { %v1544_v6 = vsel %vm1541_vm10, %v1543_v63, %v1539_v29  ;;  %v1558_v37 = vsel %vm1557_vm11, %v1877_v49, %v1554_v25  ;;  %v1572_v56 = vsub.f32 1.0, %v1571_v26 }
 0x5a6   :  { %v1586_v52 = vmul.f32 %v1881_v32, %v1544_v6  ;;  %v1563_v19 = vsel %vm1560_vm12, %v1562_v35, %v1558_v37 }
 0x5a7   :  { %v1645_v17 = vpop.f32.mrf.mxu0  ;;  %v1573_v0 = vmul.f32 %v1879_v21, %v1572_v56  ;;  %v1585_v24 = vmul.f32 %v1563_v19, %v3157_v7 }
 0x5a8   :  { %v1646_v27 = vadd.f32 %v3172_v34, %v1645_v17 }
 0x5a9   :  { %v1587_v38 = vadd.f32 %v1586_v52, %v1585_v24  ;;  %v1574_v16 = vadd.f32 %v1879_v21, %v1573_v0 }
 0x5aa   :  { %1663 = vst [vmem:[#allocation9 + $0x18] sm:$0xff] %v1646_v27 }
 0x5ab   :  { %1882 = vtanh.f32 %v1587_v38  ;;  %v1578_v40 = vsel %vm1577_vm15, %v1879_v21, %v1574_v16 }
 0x5ac   :  { %v1583_v43 = vsel %vm1580_vm0, %v1582_v8, %v1578_v40 }
 0x5af   :  { %v1648_v48 = vpop.f32.mrf.mxu0 }
 0x5b0   :  { %v1649_v5 = vadd.f32 %v3172_v34, %v1648_v48 }
 0x5b1   :  { %v1883_v44 = vpop.eup %1882 }
 0x5b2   :  { %1664 = vst [vmem:[#allocation9 + $0x20] sm:$0xff] %v1649_v5  ;;  %v1589_v7 = vmul.f32 %v1883_v44, %v1583_v43 }
 0x5b4   :  { %1656 = vmatmul.f32.gmra.mxu0 %v1589_v7 }
 0x5b7   :  { %v1651_v45 = vpop.f32.mrf.mxu0 }
 0x5b8   :  { %v1652_v13 = vadd.f32 %v3172_v34, %v1651_v45 }
 0x5ba   :  { %1665 = vst [vmem:[#allocation9 + $0x28] sm:$0xff] %v1652_v13 }
 0x5bf   :  { %v1654_v51 = vpop.f32.mrf.mxu0 }
 0x5c0   :  { %v1655_v55 = vadd.f32 %v3172_v34, %v1654_v51 }
 0x5c2   :  { %1666 = vst [vmem:[#allocation9 + $0x30] sm:$0xff] %v1655_v55 }
 0x631   :  { %v1657_v62 = vpop.f32.mrf.mxu0 }
 0x632   :  { %v1658_v3 = vadd.f32 %v3172_v34, %v1657_v62 }
 0x634   :  { %1667 = vst [vmem:[#allocation9 + $0x38] sm:$0xff] %v1658_v3 }
 0x635   :  { %1680 = dma.vmem_to_hbm [thread:$0]  %s1673_s30, 1024, %s1675_s11, [#allocation6], %s2030_s17, %s2030_s17, %s2031_s18  }
 0x636   :  { %2024 = dma.done.wait [#allocation6], 1024  }
 0x637   :  { %2025 = vsyncadd [#allocation6], 4294966272 }
 0x638   :  { %1685 = vsyncpa [#allocation5], 1 }
 0x639   :  { %1686 = vsyncpa [#allocation8], 1 }
 0x63a   :  { %1687 = vsyncpa [#allocation6], 1 }

</bundles_post_ra>
